<compile_context>
chip_gen: v7x
topology: tpu7x:2x2x1
jax: 0.10.0
libtpu: 0.0.40
codegen_flags: <defaults>
</compile_context>

<pallas_src>
import functools

import numpy as np
import jax
import jax.numpy as jnp
from jax import lax
from jax.experimental import pallas as pl
from jax.experimental.pallas import tpu as pltpu


def _round_up(x, m):
    return -(-x // m) * m


# --------------------------------------------------------------------------- #
# Kernel
# --------------------------------------------------------------------------- #
def timefreq_kernel(x_ref, red_ref, bc_ref, rhs_t_ref, wf_ref,
                    w1_ref, w2_ref, bias_ref, out_ref,
                    *, C, L, Lh_pad, D, mxu_dtype):
    f32 = jnp.float32
    x = x_ref[...].astype(f32)                       # (TM, C*L) flattened (c, l)
    inv_L = f32(1.0 / L)

    def mm(a, b):  # MXU matmul for encoder/projector (optionally bf16 operands)
        return jnp.dot(a.astype(mxu_dtype), b.astype(mxu_dtype),
                       preferred_element_type=f32)

    # --- per-(sample, channel) normalization: 2 serial MXU stages ------------
    red = red_ref[...]                               # (C*L, C)  0/1 per-channel sum
    sum_x = jnp.dot(x, red, preferred_element_type=f32)           # (TM, C)
    sum_xx = jnp.dot(x * x, red, preferred_element_type=f32)      # (TM, C) (parallel)
    mu = sum_x * inv_L
    var = jnp.maximum(sum_xx * inv_L - mu * mu, 0.0)               # clamp cancellation
    inv_sig = jnp.where(var <= 0.0, f32(1.0), lax.rsqrt(var))      # sigma<=0 -> 1
    bc = bc_ref[...]                                 # (C, C*L)  0/1 per-channel bcast
    scale_b = jnp.dot(inv_sig, bc, preferred_element_type=f32)     # (TM, C*L)
    shift_b = jnp.dot(mu * inv_sig, bc, preferred_element_type=f32)
    xt = x * scale_b - shift_b                       # normalized time signal

    # --- per-channel: fused [cos | sin | wet_c] DFT+time-encoder matmul,
    #     |FFT|, and frequency encoder (no dense block-diag, no xf slab) -------
    TM = xt.shape[0]
    ht = jnp.zeros((TM, D), f32)
    hf = jnp.zeros((TM, D), f32)
    for c in range(C):                               # short unrolled channel loop
        x_c = xt[:, c * L:(c + 1) * L]               # (TM, L)
        y = jnp.dot(x_c, rhs_t_ref[c], preferred_element_type=f32)  # (TM, 2*Lh_pad+D)
        re = y[:, :Lh_pad]                           # 128-aligned slices
        im = y[:, Lh_pad:2 * Lh_pad]
        ht = ht + y[:, 2 * Lh_pad:]                  # time-encoder contribution
        s = re * re + im * im
        mag = jnp.where(s > 0.0, s * lax.rsqrt(s), 0.0)             # |FFT| (EUP rsqrt)
        hf = hf + mm(mag, wf_ref[c])                 # folded half-spectrum weights

    # --- biases + fused block-diagonal projectors ----------------------------
    bias = bias_ref[...]                             # (3, 4D) packed biases
    b_enc = bias[0:1, :2 * D]                        # [b_enc_t | b_enc_f]
    b1 = bias[1:2, :]                                # [b1_t | b1_f]
    b2 = bias[2:3, :2 * D]                           # [b2_t | b2_f]

    h = jnp.concatenate([ht, hf], axis=1) + b_enc    # (TM, 2D) = [h_t | h_f]
    a = jnp.maximum(h, 0.0)
    a = mm(a, w1_ref[...]) + b1                      # (TM, 4D), blkdiag(w1_t, w1_f)
    a = jnp.maximum(a, 0.0)
    z = mm(a, w2_ref[...]) + b2                      # (TM, 2D) = [z_t | z_f]

    # single lane-dense (TM, 4D) store: [h_t | h_f | z_t | z_f]
    out_ref[...] = jnp.concatenate([h, z], axis=1).astype(out_ref.dtype)


# --------------------------------------------------------------------------- #
# Host-side operand packing
# --------------------------------------------------------------------------- #
def _pack_operands(params, C, L, D, Lh_pad):
    Lh = L // 2 + 1
    f32 = np.float32

    # per-channel reduce / broadcast 0/1 matrices
    red = np.zeros((C * L, C), f32)
    for c in range(C):
        red[c * L:(c + 1) * L, c] = 1.0
    bc = np.ascontiguousarray(red.T)

    # shared half-spectrum [cos | sin] matrix (L, 2*Lh_pad), fused per channel
    # with the time-encoder weight slice -> rhs_t[c] = [cos | sin | wet_c]
    ll = np.arange(L, dtype=np.float64)[:, None]
    kk = np.arange(Lh, dtype=np.float64)[None, :]
    ang = 2.0 * np.pi * ll * kk / L
    cs = np.zeros((L, 2 * Lh_pad), f32)
    cs[:, :Lh] = np.cos(ang)
    cs[:, Lh_pad:Lh_pad + Lh] = np.sin(ang)
    wet = np.asarray(params["w_enc_t"], f32)                        # (C, L, D)
    rhs_t = np.ascontiguousarray(np.concatenate(
        [np.broadcast_to(cs[None], (C, L, 2 * Lh_pad)), wet], axis=-1))

    # folded conjugate-symmetric frequency-encoder weights (|X[k]| == |X[L-k]|)
    wef = np.asarray(params["w_enc_f"], f32)                        # (C, L, D)
    wf = np.zeros((C, Lh_pad, D), f32)
    wf[:, :Lh, :] = wef[:, :Lh, :]
    for k in range(1, Lh):
        src = L - k
        if src != k:                                  # skip self-paired bin (k == L/2)
            wf[:, k, :] += wef[:, src, :]

    # block-diagonal projector weights and packed biases
    W1 = np.zeros((2 * D, 4 * D), f32)
    W1[:D, :2 * D] = np.asarray(params["w1_t"], f32)
    W1[D:, 2 * D:] = np.asarray(params["w1_f"], f32)
    W2 = np.zeros((4 * D, 2 * D), f32)
    W2[:2 * D, :D] = np.asarray(params["w2_t"], f32)
    W2[2 * D:, D:] = np.asarray(params["w2_f"], f32)
    bias = np.zeros((3, 4 * D), f32)
    bias[0, :D] = np.asarray(params["b_enc_t"], f32).reshape(-1)
    bias[0, D:2 * D] = np.asarray(params["b_enc_f"], f32).reshape(-1)
    bias[1, :2 * D] = np.asarray(params["b1_t"], f32).reshape(-1)
    bias[1, 2 * D:] = np.asarray(params["b1_f"], f32).reshape(-1)
    bias[2, :D] = np.asarray(params["b2_t"], f32).reshape(-1)
    bias[2, D:2 * D] = np.asarray(params["b2_f"], f32).reshape(-1)

    packed = dict(red=red, bc=bc, rhs_t=rhs_t, wf=wf, W1=W1, W2=W2, bias=bias)
    return {name: jnp.asarray(val) for name, val in packed.items()}


# --------------------------------------------------------------------------- #
# Wrapper
# --------------------------------------------------------------------------- #
def timefreq_forward(ts, params, *, block_n=512, mxu_dtype=jnp.float32,
                     single_buffer_resident=True, interpret=False):
    """ts: (N, C, L) float32. Returns (h_t, z_t, h_f, z_f), each (N, D) float32."""
    N, C, L = ts.shape
    D = params["w_enc_t"].shape[-1]
    Lh = L // 2 + 1
    Lh_pad = _round_up(Lh, 128)                       # lane-align re/im split point
    ops = _pack_operands(params, C, L, D, Lh_pad)

    # batch tile: multiple of 8, >=2 grid steps (2 TCs on v7x), VMEM-bounded.
    tm = int(min(block_n, max(8, _round_up(-(-N // 2), 8))))
    per_row = (4 * C * L + 3 * (2 * Lh_pad + D) + 16 * D) * 4      # f32 temporaries/row
    while tm > 8 and tm * per_row > 24 * (1 << 20):
        tm = max(8, _round_up(tm // 2, 8))
    N_pad = _round_up(N, tm)
    x = jnp.pad(ts.reshape(N, C * L), ((0, N_pad - N), (0, 0)))    # zero rows are benign

    resident = (ops["red"], ops["bc"], ops["rhs_t"], ops["wf"],
                ops["W1"], ops["W2"], ops["bias"])

    # footprint-derived VMEM limit (resident x2, streamed tiles x2, intermediates)
    resident_bytes = sum(int(np.prod(a.shape)) * 4 for a in resident)
    stream_bytes = 2 * (tm * C * L + tm * 4 * D) * 4
    vmem_limit = int(min(96 * (1 << 20),
                         max(32 * (1 << 20),
                             2 * resident_bytes + stream_bytes + 2 * tm * per_row)))

    kernel = functools.partial(timefreq_kernel, C=C, L=L, Lh_pad=Lh_pad, D=D,
                               mxu_dtype=mxu_dtype)
    grid = (N_pad // tm,)
    out_shape = jax.ShapeDtypeStruct((N_pad, 4 * D), jnp.float32)
    out_spec = pl.BlockSpec((tm, 4 * D), lambda i: (i, 0))
    cp = pltpu.CompilerParams(
        dimension_semantics=("parallel",),            # megacore / 2-TC sharding (v7x)
        vmem_limit_bytes=vmem_limit)

    def run(single_buffer):
        in_specs = [pl.BlockSpec((tm, C * L), lambda i: (i, 0))]   # streamed input tile
        for a in resident:                                          # resident operands
            nd = a.ndim
            if single_buffer:
                spec = pl.BlockSpec(a.shape, lambda i, nd=nd: (0,) * nd,
                                    pipeline_mode=pl.Buffered(1))
            else:
                spec = pl.BlockSpec(a.shape, lambda i, nd=nd: (0,) * nd)
            in_specs.append(spec)
        return pl.pallas_call(
            kernel, grid=grid, in_specs=in_specs, out_specs=out_spec,
            out_shape=out_shape, compiler_params=cp, interpret=interpret,
        )(x, *resident)

    if single_buffer_resident:
        try:
            out = run(True)
        except Exception:                 # pipeline_mode unsupported -> default buffering
            out = run(False)
    else:
        out = run(False)

    out = out[:N]
    h_t = out[:, 0 * D:1 * D]
    h_f = out[:, 1 * D:2 * D]
    z_t = out[:, 2 * D:3 * D]
    z_f = out[:, 3 * D:4 * D]
    return h_t, z_t, h_f, z_f


# --------------------------------------------------------------------------- #
# Parameters + pure-JAX reference
# --------------------------------------------------------------------------- #
def make_params(key, C, L, D):
    ks = jax.random.split(key, 12)
    s = 0.1

    def w(k, shape):
        return jax.random.normal(k, shape, jnp.float32) * s

    return {
        # synthetic encoder: equivalent to flatten + Linear(C*L -> D)
        "w_enc_t": w(ks[0], (C, L, D)), "b_enc_t": w(ks[1], (D,)),
        "w_enc_f": w(ks[2], (C, L, D)), "b_enc_f": w(ks[3], (D,)),
        # projector_t
        "w1_t": w(ks[4], (D, 2 * D)), "b1_t": w(ks[5], (2 * D,)),
        "w2_t": w(ks[6], (2 * D, D)), "b2_t": w(ks[7], (D,)),
        # projector_f
        "w1_f": w(ks[8], (D, 2 * D)), "b1_f": w(ks[9], (2 * D,)),
        "w2_f": w(ks[10], (2 * D, D)), "b2_f": w(ks[11], (D,)),
    }


def reference_forward(ts, params):
    """Pure-JAX reference of the same forward pass (full-precision matmuls)."""
    with jax.default_matmul_precision("float32"):
        mu = jnp.mean(ts, axis=2, keepdims=True)
        sigma = jnp.std(ts, axis=2, keepdims=True)
        sigma = jnp.where(sigma <= 0, 1.0, sigma)
        xt = (ts - mu) / sigma
        xf = jnp.abs(jnp.fft.fft(xt, axis=2)).astype(jnp.float32)

        def enc(x, w, b):
            return jnp.einsum("ncl,cld->nd", x, w) + b

        def proj(h, w1, b1, w2, b2):
            a = jax.nn.relu(h) @ w1 + b1
            return jax.nn.relu(a) @ w2 + b2

        h_t = enc(xt, params["w_enc_t"], params["b_enc_t"])
        h_f = enc(xf, params["w_enc_f"], params["b_enc_f"])
        z_t = proj(h_t, params["w1_t"], params["b1_t"], params["w2_t"], params["b2_t"])
        z_f = proj(h_f, params["w1_f"], params["b1_f"], params["w2_f"], params["b2_f"])
    return h_t, z_t, h_f, z_f


if __name__ == "__main__":
    # small shapes: (batch, channels, length), encoder out_dim
    N, C, L, D = 16, 4, 16, 32

    key = jax.random.PRNGKey(0)
    k_x, k_p = jax.random.split(key)
    ts = jax.random.normal(k_x, (N, C, L), jnp.float32)
    params = make_params(k_p, C, L, D)

    # block_n=8 -> tm=8, 2 grid steps: exercises the batch pipeline / 2-TC split
    outs = timefreq_forward(ts, params, block_n=8)
    outs = jax.block_until_ready(outs)

    refs = jax.block_until_ready(reference_forward(ts, params))
    for o, r in zip(outs, refs):
        np.testing.assert_allclose(np.asarray(o), np.asarray(r), rtol=2e-3, atol=2e-3)

    print("KERNEL_OK")
</pallas_src>

<mosaic_0001>
module attributes {stable_mosaic.version = 11 : i64} {
  func.func @timefreq_kernel(%arg0: i32, %arg1: memref<8x64xf32, #tpu.memory_space<vmem>>, %arg2: memref<64x4xf32, #tpu.memory_space<vmem>>, %arg3: memref<4x64xf32, #tpu.memory_space<vmem>>, %arg4: memref<4x16x288xf32, #tpu.memory_space<vmem>>, %arg5: memref<4x128x32xf32, #tpu.memory_space<vmem>>, %arg6: memref<64x128xf32, #tpu.memory_space<vmem>>, %arg7: memref<128x64xf32, #tpu.memory_space<vmem>>, %arg8: memref<3x128xf32, #tpu.memory_space<vmem>>, %arg9: memref<8x128xf32, #tpu.memory_space<vmem>>) attributes {dimension_semantics = [#tpu.dimension_semantics<parallel>], iteration_bounds = array<i64: 2>, scalar_prefetch = 0 : i64, scratch_operands = 0 : i64, tpu.core_type = #tpu.core_type<tc>, window_params = [{transform_indices = @transform_0, window_bounds = array<i64: 8, 64>}, {pipeline_mode = #tpu.pipeline_mode<synchronous>, transform_indices = @transform_1, window_bounds = array<i64: 64, 4>}, {pipeline_mode = #tpu.pipeline_mode<synchronous>, transform_indices = @transform_2, window_bounds = array<i64: 4, 64>}, {pipeline_mode = #tpu.pipeline_mode<synchronous>, transform_indices = @transform_3, window_bounds = array<i64: 4, 16, 288>}, {pipeline_mode = #tpu.pipeline_mode<synchronous>, transform_indices = @transform_4, window_bounds = array<i64: 4, 128, 32>}, {pipeline_mode = #tpu.pipeline_mode<synchronous>, transform_indices = @transform_5, window_bounds = array<i64: 64, 128>}, {pipeline_mode = #tpu.pipeline_mode<synchronous>, transform_indices = @transform_6, window_bounds = array<i64: 128, 64>}, {pipeline_mode = #tpu.pipeline_mode<synchronous>, transform_indices = @transform_7, window_bounds = array<i64: 3, 128>}, {transform_indices = @transform_8, window_bounds = array<i64: 8, 128>}]} {
    %c0 = arith.constant 0 : index
    %c0_0 = arith.constant 0 : index
    %0 = vector.load %arg1[%c0, %c0_0] : memref<8x64xf32, #tpu.memory_space<vmem>>, vector<8x64xf32>
    %c0_1 = arith.constant 0 : index
    %c0_2 = arith.constant 0 : index
    %1 = vector.load %arg2[%c0_1, %c0_2] : memref<64x4xf32, #tpu.memory_space<vmem>>, vector<64x4xf32>
    %cst = arith.constant dense<0.000000e+00> : vector<8x4xf32>
    %2 = tpu.matmul %0, %1, %cst {dimension_numbers = #tpu.dot_dimension_numbers<[1], [0], [0], [1], [0, 0, 1, 1], [], []>} : vector<8x64xf32>, vector<64x4xf32>, vector<8x4xf32> -> vector<8x4xf32>
    %3 = arith.mulf %0, %0 : vector<8x64xf32>
    %cst_3 = arith.constant dense<0.000000e+00> : vector<8x4xf32>
    %4 = tpu.matmul %3, %1, %cst_3 {dimension_numbers = #tpu.dot_dimension_numbers<[1], [0], [0], [1], [0, 0, 1, 1], [], []>} : vector<8x64xf32>, vector<64x4xf32>, vector<8x4xf32> -> vector<8x4xf32>
    %cst_4 = arith.constant 6.250000e-02 : f32
    %5 = vector.broadcast %cst_4 : f32 to vector<8x4xf32>
    %6 = arith.mulf %2, %5 : vector<8x4xf32>
    %cst_5 = arith.constant 6.250000e-02 : f32
    %7 = vector.broadcast %cst_5 : f32 to vector<8x4xf32>
    %8 = arith.mulf %4, %7 : vector<8x4xf32>
    %9 = arith.mulf %6, %6 : vector<8x4xf32>
    %10 = arith.subf %8, %9 : vector<8x4xf32>
    %cst_6 = arith.constant 0.000000e+00 : f32
    %11 = vector.broadcast %cst_6 : f32 to vector<8x4xf32>
    %12 = arith.maximumf %10, %11 : vector<8x4xf32>
    %cst_7 = arith.constant 0.000000e+00 : f32
    %13 = vector.broadcast %cst_7 : f32 to vector<8x4xf32>
    %14 = arith.cmpf ole, %12, %13 : vector<8x4xf32>
    %15 = math.rsqrt %12 : vector<8x4xf32>
    %cst_8 = arith.constant 1.000000e+00 : f32
    %16 = vector.broadcast %cst_8 : f32 to vector<8x4xf32>
    %17 = arith.select %14, %16, %15 : vector<8x4xi1>, vector<8x4xf32>
    %c0_9 = arith.constant 0 : index
    %c0_10 = arith.constant 0 : index
    %18 = vector.load %arg3[%c0_9, %c0_10] : memref<4x64xf32, #tpu.memory_space<vmem>>, vector<4x64xf32>
    %cst_11 = arith.constant dense<0.000000e+00> : vector<8x64xf32>
    %19 = tpu.matmul %17, %18, %cst_11 {dimension_numbers = #tpu.dot_dimension_numbers<[1], [0], [0], [1], [0, 0, 1, 1], [], []>} : vector<8x4xf32>, vector<4x64xf32>, vector<8x64xf32> -> vector<8x64xf32>
    %20 = arith.mulf %6, %17 : vector<8x4xf32>
    %cst_12 = arith.constant dense<0.000000e+00> : vector<8x64xf32>
    %21 = tpu.matmul %20, %18, %cst_12 {dimension_numbers = #tpu.dot_dimension_numbers<[1], [0], [0], [1], [0, 0, 1, 1], [], []>} : vector<8x4xf32>, vector<4x64xf32>, vector<8x64xf32> -> vector<8x64xf32>
    %22 = arith.mulf %0, %19 : vector<8x64xf32>
    %23 = arith.subf %22, %21 : vector<8x64xf32>
    %cst_13 = arith.constant 0.000000e+00 : f32
    %24 = vector.broadcast %cst_13 : f32 to vector<8x32xf32>
    %cst_14 = arith.constant 0.000000e+00 : f32
    %25 = vector.broadcast %cst_14 : f32 to vector<8x32xf32>
    %26 = vector.extract_strided_slice %23 {offsets = [0, 0], sizes = [8, 16], strides = [1, 1]} : vector<8x64xf32> to vector<8x16xf32>
    %c0_15 = arith.constant 0 : index
    %c0_16 = arith.constant 0 : index
    %c0_17 = arith.constant 0 : index
    %27 = vector.load %arg4[%c0_15, %c0_16, %c0_17] : memref<4x16x288xf32, #tpu.memory_space<vmem>>, vector<1x16x288xf32>
    %28 = vector.shape_cast %27 : vector<1x16x288xf32> to vector<16x288xf32>
    %cst_18 = arith.constant dense<0.000000e+00> : vector<8x288xf32>
    %29 = tpu.matmul %26, %28, %cst_18 {dimension_numbers = #tpu.dot_dimension_numbers<[1], [0], [0], [1], [0, 0, 1, 1], [], []>} : vector<8x16xf32>, vector<16x288xf32>, vector<8x288xf32> -> vector<8x288xf32>
    %30 = vector.extract_strided_slice %29 {offsets = [0, 0], sizes = [8, 128], strides = [1, 1]} : vector<8x288xf32> to vector<8x128xf32>
    %31 = vector.extract_strided_slice %29 {offsets = [0, 128], sizes = [8, 128], strides = [1, 1]} : vector<8x288xf32> to vector<8x128xf32>
    %32 = vector.extract_strided_slice %29 {offsets = [0, 256], sizes = [8, 32], strides = [1, 1]} : vector<8x288xf32> to vector<8x32xf32>
    %33 = arith.addf %24, %32 : vector<8x32xf32>
    %34 = arith.mulf %30, %30 : vector<8x128xf32>
    %35 = arith.mulf %31, %31 : vector<8x128xf32>
    %36 = arith.addf %34, %35 : vector<8x128xf32>
    %cst_19 = arith.constant 0.000000e+00 : f32
    %37 = vector.broadcast %cst_19 : f32 to vector<8x128xf32>
    %38 = arith.cmpf ogt, %36, %37 : vector<8x128xf32>
    %39 = math.rsqrt %36 : vector<8x128xf32>
    %40 = arith.mulf %36, %39 : vector<8x128xf32>
    %cst_20 = arith.constant 0.000000e+00 : f32
    %41 = vector.broadcast %cst_20 : f32 to vector<8x128xf32>
    %42 = arith.select %38, %40, %41 : vector<8x128xi1>, vector<8x128xf32>
    %c0_21 = arith.constant 0 : index
    %c0_22 = arith.constant 0 : index
    %c0_23 = arith.constant 0 : index
    %43 = vector.load %arg5[%c0_21, %c0_22, %c0_23] : memref<4x128x32xf32, #tpu.memory_space<vmem>>, vector<1x128x32xf32>
    %44 = vector.shape_cast %43 : vector<1x128x32xf32> to vector<128x32xf32>
    %cst_24 = arith.constant dense<0.000000e+00> : vector<8x32xf32>
    %45 = tpu.matmul %42, %44, %cst_24 {dimension_numbers = #tpu.dot_dimension_numbers<[1], [0], [0], [1], [0, 0, 1, 1], [], []>} : vector<8x128xf32>, vector<128x32xf32>, vector<8x32xf32> -> vector<8x32xf32>
    %46 = arith.addf %25, %45 : vector<8x32xf32>
    %47 = vector.extract_strided_slice %23 {offsets = [0, 16], sizes = [8, 16], strides = [1, 1]} : vector<8x64xf32> to vector<8x16xf32>
    %c1 = arith.constant 1 : index
    %c0_25 = arith.constant 0 : index
    %c0_26 = arith.constant 0 : index
    %48 = vector.load %arg4[%c1, %c0_25, %c0_26] : memref<4x16x288xf32, #tpu.memory_space<vmem>>, vector<1x16x288xf32>
    %49 = vector.shape_cast %48 : vector<1x16x288xf32> to vector<16x288xf32>
    %cst_27 = arith.constant dense<0.000000e+00> : vector<8x288xf32>
    %50 = tpu.matmul %47, %49, %cst_27 {dimension_numbers = #tpu.dot_dimension_numbers<[1], [0], [0], [1], [0, 0, 1, 1], [], []>} : vector<8x16xf32>, vector<16x288xf32>, vector<8x288xf32> -> vector<8x288xf32>
    %51 = vector.extract_strided_slice %50 {offsets = [0, 0], sizes = [8, 128], strides = [1, 1]} : vector<8x288xf32> to vector<8x128xf32>
    %52 = vector.extract_strided_slice %50 {offsets = [0, 128], sizes = [8, 128], strides = [1, 1]} : vector<8x288xf32> to vector<8x128xf32>
    %53 = vector.extract_strided_slice %50 {offsets = [0, 256], sizes = [8, 32], strides = [1, 1]} : vector<8x288xf32> to vector<8x32xf32>
    %54 = arith.addf %33, %53 : vector<8x32xf32>
    %55 = arith.mulf %51, %51 : vector<8x128xf32>
    %56 = arith.mulf %52, %52 : vector<8x128xf32>
    %57 = arith.addf %55, %56 : vector<8x128xf32>
    %cst_28 = arith.constant 0.000000e+00 : f32
    %58 = vector.broadcast %cst_28 : f32 to vector<8x128xf32>
    %59 = arith.cmpf ogt, %57, %58 : vector<8x128xf32>
    %60 = math.rsqrt %57 : vector<8x128xf32>
    %61 = arith.mulf %57, %60 : vector<8x128xf32>
    %cst_29 = arith.constant 0.000000e+00 : f32
    %62 = vector.broadcast %cst_29 : f32 to vector<8x128xf32>
    %63 = arith.select %59, %61, %62 : vector<8x128xi1>, vector<8x128xf32>
    %c1_30 = arith.constant 1 : index
    %c0_31 = arith.constant 0 : index
    %c0_32 = arith.constant 0 : index
    %64 = vector.load %arg5[%c1_30, %c0_31, %c0_32] : memref<4x128x32xf32, #tpu.memory_space<vmem>>, vector<1x128x32xf32>
    %65 = vector.shape_cast %64 : vector<1x128x32xf32> to vector<128x32xf32>
    %cst_33 = arith.constant dense<0.000000e+00> : vector<8x32xf32>
    %66 = tpu.matmul %63, %65, %cst_33 {dimension_numbers = #tpu.dot_dimension_numbers<[1], [0], [0], [1], [0, 0, 1, 1], [], []>} : vector<8x128xf32>, vector<128x32xf32>, vector<8x32xf32> -> vector<8x32xf32>
    %67 = arith.addf %46, %66 : vector<8x32xf32>
    %68 = vector.extract_strided_slice %23 {offsets = [0, 32], sizes = [8, 16], strides = [1, 1]} : vector<8x64xf32> to vector<8x16xf32>
    %c2 = arith.constant 2 : index
    %c0_34 = arith.constant 0 : index
    %c0_35 = arith.constant 0 : index
    %69 = vector.load %arg4[%c2, %c0_34, %c0_35] : memref<4x16x288xf32, #tpu.memory_space<vmem>>, vector<1x16x288xf32>
    %70 = vector.shape_cast %69 : vector<1x16x288xf32> to vector<16x288xf32>
    %cst_36 = arith.constant dense<0.000000e+00> : vector<8x288xf32>
    %71 = tpu.matmul %68, %70, %cst_36 {dimension_numbers = #tpu.dot_dimension_numbers<[1], [0], [0], [1], [0, 0, 1, 1], [], []>} : vector<8x16xf32>, vector<16x288xf32>, vector<8x288xf32> -> vector<8x288xf32>
    %72 = vector.extract_strided_slice %71 {offsets = [0, 0], sizes = [8, 128], strides = [1, 1]} : vector<8x288xf32> to vector<8x128xf32>
    %73 = vector.extract_strided_slice %71 {offsets = [0, 128], sizes = [8, 128], strides = [1, 1]} : vector<8x288xf32> to vector<8x128xf32>
    %74 = vector.extract_strided_slice %71 {offsets = [0, 256], sizes = [8, 32], strides = [1, 1]} : vector<8x288xf32> to vector<8x32xf32>
    %75 = arith.addf %54, %74 : vector<8x32xf32>
    %76 = arith.mulf %72, %72 : vector<8x128xf32>
    %77 = arith.mulf %73, %73 : vector<8x128xf32>
    %78 = arith.addf %76, %77 : vector<8x128xf32>
    %cst_37 = arith.constant 0.000000e+00 : f32
    %79 = vector.broadcast %cst_37 : f32 to vector<8x128xf32>
    %80 = arith.cmpf ogt, %78, %79 : vector<8x128xf32>
    %81 = math.rsqrt %78 : vector<8x128xf32>
    %82 = arith.mulf %78, %81 : vector<8x128xf32>
    %cst_38 = arith.constant 0.000000e+00 : f32
    %83 = vector.broadcast %cst_38 : f32 to vector<8x128xf32>
    %84 = arith.select %80, %82, %83 : vector<8x128xi1>, vector<8x128xf32>
    %c2_39 = arith.constant 2 : index
    %c0_40 = arith.constant 0 : index
    %c0_41 = arith.constant 0 : index
    %85 = vector.load %arg5[%c2_39, %c0_40, %c0_41] : memref<4x128x32xf32, #tpu.memory_space<vmem>>, vector<1x128x32xf32>
    %86 = vector.shape_cast %85 : vector<1x128x32xf32> to vector<128x32xf32>
    %cst_42 = arith.constant dense<0.000000e+00> : vector<8x32xf32>
    %87 = tpu.matmul %84, %86, %cst_42 {dimension_numbers = #tpu.dot_dimension_numbers<[1], [0], [0], [1], [0, 0, 1, 1], [], []>} : vector<8x128xf32>, vector<128x32xf32>, vector<8x32xf32> -> vector<8x32xf32>
    %88 = arith.addf %67, %87 : vector<8x32xf32>
    %89 = vector.extract_strided_slice %23 {offsets = [0, 48], sizes = [8, 16], strides = [1, 1]} : vector<8x64xf32> to vector<8x16xf32>
    %c3 = arith.constant 3 : index
    %c0_43 = arith.constant 0 : index
    %c0_44 = arith.constant 0 : index
    %90 = vector.load %arg4[%c3, %c0_43, %c0_44] : memref<4x16x288xf32, #tpu.memory_space<vmem>>, vector<1x16x288xf32>
    %91 = vector.shape_cast %90 : vector<1x16x288xf32> to vector<16x288xf32>
    %cst_45 = arith.constant dense<0.000000e+00> : vector<8x288xf32>
    %92 = tpu.matmul %89, %91, %cst_45 {dimension_numbers = #tpu.dot_dimension_numbers<[1], [0], [0], [1], [0, 0, 1, 1], [], []>} : vector<8x16xf32>, vector<16x288xf32>, vector<8x288xf32> -> vector<8x288xf32>
    %93 = vector.extract_strided_slice %92 {offsets = [0, 0], sizes = [8, 128], strides = [1, 1]} : vector<8x288xf32> to vector<8x128xf32>
    %94 = vector.extract_strided_slice %92 {offsets = [0, 128], sizes = [8, 128], strides = [1, 1]} : vector<8x288xf32> to vector<8x128xf32>
    %95 = vector.extract_strided_slice %92 {offsets = [0, 256], sizes = [8, 32], strides = [1, 1]} : vector<8x288xf32> to vector<8x32xf32>
    %96 = arith.addf %75, %95 : vector<8x32xf32>
    %97 = arith.mulf %93, %93 : vector<8x128xf32>
    %98 = arith.mulf %94, %94 : vector<8x128xf32>
    %99 = arith.addf %97, %98 : vector<8x128xf32>
    %cst_46 = arith.constant 0.000000e+00 : f32
    %100 = vector.broadcast %cst_46 : f32 to vector<8x128xf32>
    %101 = arith.cmpf ogt, %99, %100 : vector<8x128xf32>
    %102 = math.rsqrt %99 : vector<8x128xf32>
    %103 = arith.mulf %99, %102 : vector<8x128xf32>
    %cst_47 = arith.constant 0.000000e+00 : f32
    %104 = vector.broadcast %cst_47 : f32 to vector<8x128xf32>
    %105 = arith.select %101, %103, %104 : vector<8x128xi1>, vector<8x128xf32>
    %c3_48 = arith.constant 3 : index
    %c0_49 = arith.constant 0 : index
    %c0_50 = arith.constant 0 : index
    %106 = vector.load %arg5[%c3_48, %c0_49, %c0_50] : memref<4x128x32xf32, #tpu.memory_space<vmem>>, vector<1x128x32xf32>
    %107 = vector.shape_cast %106 : vector<1x128x32xf32> to vector<128x32xf32>
    %cst_51 = arith.constant dense<0.000000e+00> : vector<8x32xf32>
    %108 = tpu.matmul %105, %107, %cst_51 {dimension_numbers = #tpu.dot_dimension_numbers<[1], [0], [0], [1], [0, 0, 1, 1], [], []>} : vector<8x128xf32>, vector<128x32xf32>, vector<8x32xf32> -> vector<8x32xf32>
    %109 = arith.addf %88, %108 : vector<8x32xf32>
    %c0_52 = arith.constant 0 : index
    %c0_53 = arith.constant 0 : index
    %110 = vector.load %arg8[%c0_52, %c0_53] : memref<3x128xf32, #tpu.memory_space<vmem>>, vector<3x128xf32>
    %111 = vector.extract_strided_slice %110 {offsets = [0, 0], sizes = [1, 64], strides = [1, 1]} : vector<3x128xf32> to vector<1x64xf32>
    %112 = vector.extract_strided_slice %110 {offsets = [1, 0], sizes = [1, 128], strides = [1, 1]} : vector<3x128xf32> to vector<1x128xf32>
    %113 = vector.extract_strided_slice %110 {offsets = [2, 0], sizes = [1, 64], strides = [1, 1]} : vector<3x128xf32> to vector<1x64xf32>
    %114 = tpu.concatenate %96, %109 in 1 : vector<8x32xf32>, vector<8x32xf32> -> vector<8x64xf32>
    %115 = vector.broadcast %111 : vector<1x64xf32> to vector<8x64xf32>
    %116 = arith.addf %114, %115 : vector<8x64xf32>
    %cst_54 = arith.constant 0.000000e+00 : f32
    %117 = vector.broadcast %cst_54 : f32 to vector<8x64xf32>
    %118 = arith.maximumf %116, %117 : vector<8x64xf32>
    %c0_55 = arith.constant 0 : index
    %c0_56 = arith.constant 0 : index
    %119 = vector.load %arg6[%c0_55, %c0_56] : memref<64x128xf32, #tpu.memory_space<vmem>>, vector<64x128xf32>
    %cst_57 = arith.constant dense<0.000000e+00> : vector<8x128xf32>
    %120 = tpu.matmul %118, %119, %cst_57 {dimension_numbers = #tpu.dot_dimension_numbers<[1], [0], [0], [1], [0, 0, 1, 1], [], []>} : vector<8x64xf32>, vector<64x128xf32>, vector<8x128xf32> -> vector<8x128xf32>
    %121 = vector.broadcast %112 : vector<1x128xf32> to vector<8x128xf32>
    %122 = arith.addf %120, %121 : vector<8x128xf32>
    %cst_58 = arith.constant 0.000000e+00 : f32
    %123 = vector.broadcast %cst_58 : f32 to vector<8x128xf32>
    %124 = arith.maximumf %122, %123 : vector<8x128xf32>
    %c0_59 = arith.constant 0 : index
    %c0_60 = arith.constant 0 : index
    %125 = vector.load %arg7[%c0_59, %c0_60] : memref<128x64xf32, #tpu.memory_space<vmem>>, vector<128x64xf32>
    %cst_61 = arith.constant dense<0.000000e+00> : vector<8x64xf32>
    %126 = tpu.matmul %124, %125, %cst_61 {dimension_numbers = #tpu.dot_dimension_numbers<[1], [0], [0], [1], [0, 0, 1, 1], [], []>} : vector<8x128xf32>, vector<128x64xf32>, vector<8x64xf32> -> vector<8x64xf32>
    %127 = vector.broadcast %113 : vector<1x64xf32> to vector<8x64xf32>
    %128 = arith.addf %126, %127 : vector<8x64xf32>
    %129 = tpu.concatenate %116, %128 in 1 : vector<8x64xf32>, vector<8x64xf32> -> vector<8x128xf32>
    %c0_62 = arith.constant 0 : index
    %c0_63 = arith.constant 0 : index
    %130 = vector.load %arg9[%c0_62, %c0_63] : memref<8x128xf32, #tpu.memory_space<vmem>>, vector<8x128xf32>
    tpu.vector_store %arg9[%c0_62, %c0_63], %129 {strides = array<i32>} : memref<8x128xf32, #tpu.memory_space<vmem>>, vector<8x128xf32>,
    return
  }
  func.func @transform_0(%arg0: i32) -> (i32, i32) {
    %c0_i32 = arith.constant 0 : i32
    %c0_i32_0 = arith.constant 0 : i32
    return %arg0, %c0_i32 : i32, i32
  }
  func.func @transform_1(%arg0: i32) -> (i32, i32) {
    %c0_i32 = arith.constant 0 : i32
    %c0_i32_0 = arith.constant 0 : i32
    %c0_i32_1 = arith.constant 0 : i32
    return %c0_i32, %c0_i32_0 : i32, i32
  }
  func.func @transform_2(%arg0: i32) -> (i32, i32) {
    %c0_i32 = arith.constant 0 : i32
    %c0_i32_0 = arith.constant 0 : i32
    %c0_i32_1 = arith.constant 0 : i32
    return %c0_i32, %c0_i32_0 : i32, i32
  }
  func.func @transform_3(%arg0: i32) -> (i32, i32, i32) {
    %c0_i32 = arith.constant 0 : i32
    %c0_i32_0 = arith.constant 0 : i32
    %c0_i32_1 = arith.constant 0 : i32
    %c0_i32_2 = arith.constant 0 : i32
    return %c0_i32, %c0_i32_0, %c0_i32_1 : i32, i32, i32
  }
  func.func @transform_4(%arg0: i32) -> (i32, i32, i32) {
    %c0_i32 = arith.constant 0 : i32
    %c0_i32_0 = arith.constant 0 : i32
    %c0_i32_1 = arith.constant 0 : i32
    %c0_i32_2 = arith.constant 0 : i32
    return %c0_i32, %c0_i32_0, %c0_i32_1 : i32, i32, i32
  }
  func.func @transform_5(%arg0: i32) -> (i32, i32) {
    %c0_i32 = arith.constant 0 : i32
    %c0_i32_0 = arith.constant 0 : i32
    %c0_i32_1 = arith.constant 0 : i32
    return %c0_i32, %c0_i32_0 : i32, i32
  }
  func.func @transform_6(%arg0: i32) -> (i32, i32) {
    %c0_i32 = arith.constant 0 : i32
    %c0_i32_0 = arith.constant 0 : i32
    %c0_i32_1 = arith.constant 0 : i32
    return %c0_i32, %c0_i32_0 : i32, i32
  }
  func.func @transform_7(%arg0: i32) -> (i32, i32) {
    %c0_i32 = arith.constant 0 : i32
    %c0_i32_0 = arith.constant 0 : i32
    %c0_i32_1 = arith.constant 0 : i32
    return %c0_i32, %c0_i32_0 : i32, i32
  }
  func.func @transform_8(%arg0: i32) -> (i32, i32) {
    %c0_i32 = arith.constant 0 : i32
    %c0_i32_0 = arith.constant 0 : i32
    return %arg0, %c0_i32 : i32, i32
  }
}

module attributes {stable_mosaic.version = 11 : i64} {
  func.func @timefreq_kernel(%arg0: i32, %arg1: memref<8x64xf32, #tpu.memory_space<vmem>>, %arg2: memref<64x4xf32, #tpu.memory_space<vmem>>, %arg3: memref<4x64xf32, #tpu.memory_space<vmem>>, %arg4: memref<4x16x288xf32, #tpu.memory_space<vmem>>, %arg5: memref<4x128x32xf32, #tpu.memory_space<vmem>>, %arg6: memref<64x128xf32, #tpu.memory_space<vmem>>, %arg7: memref<128x64xf32, #tpu.memory_space<vmem>>, %arg8: memref<3x128xf32, #tpu.memory_space<vmem>>, %arg9: memref<8x128xf32, #tpu.memory_space<vmem>>) attributes {dimension_semantics = [#tpu.dimension_semantics<parallel>], iteration_bounds = array<i64: 2>, scalar_prefetch = 0 : i64, scratch_operands = 0 : i64, tpu.core_type = #tpu.core_type<tc>, window_params = [{transform_indices = @transform_0, window_bounds = array<i64: 8, 64>}, {pipeline_mode = #tpu.pipeline_mode<synchronous>, transform_indices = @transform_1, window_bounds = array<i64: 64, 4>}, {pipeline_mode = #tpu.pipeline_mode<synchronous>, transform_indices = @transform_2, window_bounds = array<i64: 4, 64>}, {pipeline_mode = #tpu.pipeline_mode<synchronous>, transform_indices = @transform_3, window_bounds = array<i64: 4, 16, 288>}, {pipeline_mode = #tpu.pipeline_mode<synchronous>, transform_indices = @transform_4, window_bounds = array<i64: 4, 128, 32>}, {pipeline_mode = #tpu.pipeline_mode<synchronous>, transform_indices = @transform_5, window_bounds = array<i64: 64, 128>}, {pipeline_mode = #tpu.pipeline_mode<synchronous>, transform_indices = @transform_6, window_bounds = array<i64: 128, 64>}, {pipeline_mode = #tpu.pipeline_mode<synchronous>, transform_indices = @transform_7, window_bounds = array<i64: 3, 128>}, {transform_indices = @transform_8, window_bounds = array<i64: 8, 128>}]} {
    %c0 = arith.constant 0 : index
    %c0_0 = arith.constant 0 : index
    %0 = vector.load %arg1[%c0, %c0_0] : memref<8x64xf32, #tpu.memory_space<vmem>>, vector<8x64xf32>
    %c0_1 = arith.constant 0 : index
    %c0_2 = arith.constant 0 : index
    %1 = vector.load %arg2[%c0_1, %c0_2] : memref<64x4xf32, #tpu.memory_space<vmem>>, vector<64x4xf32>
    %cst = arith.constant dense<0.000000e+00> : vector<8x4xf32>
    %2 = tpu.matmul %0, %1, %cst {dimension_numbers = #tpu.dot_dimension_numbers<[1], [0], [0], [1], [0, 0, 1, 1], [], []>} : vector<8x64xf32>, vector<64x4xf32>, vector<8x4xf32> -> vector<8x4xf32>
    %3 = arith.mulf %0, %0 : vector<8x64xf32>
    %cst_3 = arith.constant dense<0.000000e+00> : vector<8x4xf32>
    %4 = tpu.matmul %3, %1, %cst_3 {dimension_numbers = #tpu.dot_dimension_numbers<[1], [0], [0], [1], [0, 0, 1, 1], [], []>} : vector<8x64xf32>, vector<64x4xf32>, vector<8x4xf32> -> vector<8x4xf32>
    %cst_4 = arith.constant 6.250000e-02 : f32
    %5 = vector.broadcast %cst_4 : f32 to vector<8x4xf32>
    %6 = arith.mulf %2, %5 : vector<8x4xf32>
    %cst_5 = arith.constant 6.250000e-02 : f32
    %7 = vector.broadcast %cst_5 : f32 to vector<8x4xf32>
    %8 = arith.mulf %4, %7 : vector<8x4xf32>
    %9 = arith.mulf %6, %6 : vector<8x4xf32>
    %10 = arith.subf %8, %9 : vector<8x4xf32>
    %cst_6 = arith.constant 0.000000e+00 : f32
    %11 = vector.broadcast %cst_6 : f32 to vector<8x4xf32>
    %12 = arith.maximumf %10, %11 : vector<8x4xf32>
    %cst_7 = arith.constant 0.000000e+00 : f32
    %13 = vector.broadcast %cst_7 : f32 to vector<8x4xf32>
    %14 = arith.cmpf ole, %12, %13 : vector<8x4xf32>
    %15 = math.rsqrt %12 : vector<8x4xf32>
    %cst_8 = arith.constant 1.000000e+00 : f32
    %16 = vector.broadcast %cst_8 : f32 to vector<8x4xf32>
    %17 = arith.select %14, %16, %15 : vector<8x4xi1>, vector<8x4xf32>
    %c0_9 = arith.constant 0 : index
    %c0_10 = arith.constant 0 : index
    %18 = vector.load %arg3[%c0_9, %c0_10] : memref<4x64xf32, #tpu.memory_space<vmem>>, vector<4x64xf32>
    %cst_11 = arith.constant dense<0.000000e+00> : vector<8x64xf32>
    %19 = tpu.matmul %17, %18, %cst_11 {dimension_numbers = #tpu.dot_dimension_numbers<[1], [0], [0], [1], [0, 0, 1, 1], [], []>} : vector<8x4xf32>, vector<4x64xf32>, vector<8x64xf32> -> vector<8x64xf32>
    %20 = arith.mulf %6, %17 : vector<8x4xf32>
    %cst_12 = arith.constant dense<0.000000e+00> : vector<8x64xf32>
    %21 = tpu.matmul %20, %18, %cst_12 {dimension_numbers = #tpu.dot_dimension_numbers<[1], [0], [0], [1], [0, 0, 1, 1], [], []>} : vector<8x4xf32>, vector<4x64xf32>, vector<8x64xf32> -> vector<8x64xf32>
    %22 = arith.mulf %0, %19 : vector<8x64xf32>
    %23 = arith.subf %22, %21 : vector<8x64xf32>
    %cst_13 = arith.constant 0.000000e+00 : f32
    %24 = vector.broadcast %cst_13 : f32 to vector<8x32xf32>
    %cst_14 = arith.constant 0.000000e+00 : f32
    %25 = vector.broadcast %cst_14 : f32 to vector<8x32xf32>
    %26 = vector.extract_strided_slice %23 {offsets = [0, 0], sizes = [8, 16], strides = [1, 1]} : vector<8x64xf32> to vector<8x16xf32>
    %c0_15 = arith.constant 0 : index
    %c0_16 = arith.constant 0 : index
    %c0_17 = arith.constant 0 : index
    %27 = vector.load %arg4[%c0_15, %c0_16, %c0_17] : memref<4x16x288xf32, #tpu.memory_space<vmem>>, vector<1x16x288xf32>
    %28 = vector.shape_cast %27 : vector<1x16x288xf32> to vector<16x288xf32>
    %cst_18 = arith.constant dense<0.000000e+00> : vector<8x288xf32>
    %29 = tpu.matmul %26, %28, %cst_18 {dimension_numbers = #tpu.dot_dimension_numbers<[1], [0], [0], [1], [0, 0, 1, 1], [], []>} : vector<8x16xf32>, vector<16x288xf32>, vector<8x288xf32> -> vector<8x288xf32>
    %30 = vector.extract_strided_slice %29 {offsets = [0, 0], sizes = [8, 128], strides = [1, 1]} : vector<8x288xf32> to vector<8x128xf32>
    %31 = vector.extract_strided_slice %29 {offsets = [0, 128], sizes = [8, 128], strides = [1, 1]} : vector<8x288xf32> to vector<8x128xf32>
    %32 = vector.extract_strided_slice %29 {offsets = [0, 256], sizes = [8, 32], strides = [1, 1]} : vector<8x288xf32> to vector<8x32xf32>
    %33 = arith.addf %24, %32 : vector<8x32xf32>
    %34 = arith.mulf %30, %30 : vector<8x128xf32>
    %35 = arith.mulf %31, %31 : vector<8x128xf32>
    %36 = arith.addf %34, %35 : vector<8x128xf32>
    %cst_19 = arith.constant 0.000000e+00 : f32
    %37 = vector.broadcast %cst_19 : f32 to vector<8x128xf32>
    %38 = arith.cmpf ogt, %36, %37 : vector<8x128xf32>
    %39 = math.rsqrt %36 : vector<8x128xf32>
    %40 = arith.mulf %36, %39 : vector<8x128xf32>
    %cst_20 = arith.constant 0.000000e+00 : f32
    %41 = vector.broadcast %cst_20 : f32 to vector<8x128xf32>
    %42 = arith.select %38, %40, %41 : vector<8x128xi1>, vector<8x128xf32>
    %c0_21 = arith.constant 0 : index
    %c0_22 = arith.constant 0 : index
    %c0_23 = arith.constant 0 : index
    %43 = vector.load %arg5[%c0_21, %c0_22, %c0_23] : memref<4x128x32xf32, #tpu.memory_space<vmem>>, vector<1x128x32xf32>
    %44 = vector.shape_cast %43 : vector<1x128x32xf32> to vector<128x32xf32>
    %cst_24 = arith.constant dense<0.000000e+00> : vector<8x32xf32>
    %45 = tpu.matmul %42, %44, %cst_24 {dimension_numbers = #tpu.dot_dimension_numbers<[1], [0], [0], [1], [0, 0, 1, 1], [], []>} : vector<8x128xf32>, vector<128x32xf32>, vector<8x32xf32> -> vector<8x32xf32>
    %46 = arith.addf %25, %45 : vector<8x32xf32>
    %47 = vector.extract_strided_slice %23 {offsets = [0, 16], sizes = [8, 16], strides = [1, 1]} : vector<8x64xf32> to vector<8x16xf32>
    %c1 = arith.constant 1 : index
    %c0_25 = arith.constant 0 : index
    %c0_26 = arith.constant 0 : index
    %48 = vector.load %arg4[%c1, %c0_25, %c0_26] : memref<4x16x288xf32, #tpu.memory_space<vmem>>, vector<1x16x288xf32>
    %49 = vector.shape_cast %48 : vector<1x16x288xf32> to vector<16x288xf32>
    %cst_27 = arith.constant dense<0.000000e+00> : vector<8x288xf32>
    %50 = tpu.matmul %47, %49, %cst_27 {dimension_numbers = #tpu.dot_dimension_numbers<[1], [0], [0], [1], [0, 0, 1, 1], [], []>} : vector<8x16xf32>, vector<16x288xf32>, vector<8x288xf32> -> vector<8x288xf32>
    %51 = vector.extract_strided_slice %50 {offsets = [0, 0], sizes = [8, 128], strides = [1, 1]} : vector<8x288xf32> to vector<8x128xf32>
    %52 = vector.extract_strided_slice %50 {offsets = [0, 128], sizes = [8, 128], strides = [1, 1]} : vector<8x288xf32> to vector<8x128xf32>
    %53 = vector.extract_strided_slice %50 {offsets = [0, 256], sizes = [8, 32], strides = [1, 1]} : vector<8x288xf32> to vector<8x32xf32>
    %54 = arith.addf %33, %53 : vector<8x32xf32>
    %55 = arith.mulf %51, %51 : vector<8x128xf32>
    %56 = arith.mulf %52, %52 : vector<8x128xf32>
    %57 = arith.addf %55, %56 : vector<8x128xf32>
    %cst_28 = arith.constant 0.000000e+00 : f32
    %58 = vector.broadcast %cst_28 : f32 to vector<8x128xf32>
    %59 = arith.cmpf ogt, %57, %58 : vector<8x128xf32>
    %60 = math.rsqrt %57 : vector<8x128xf32>
    %61 = arith.mulf %57, %60 : vector<8x128xf32>
    %cst_29 = arith.constant 0.000000e+00 : f32
    %62 = vector.broadcast %cst_29 : f32 to vector<8x128xf32>
    %63 = arith.select %59, %61, %62 : vector<8x128xi1>, vector<8x128xf32>
    %c1_30 = arith.constant 1 : index
    %c0_31 = arith.constant 0 : index
    %c0_32 = arith.constant 0 : index
    %64 = vector.load %arg5[%c1_30, %c0_31, %c0_32] : memref<4x128x32xf32, #tpu.memory_space<vmem>>, vector<1x128x32xf32>
    %65 = vector.shape_cast %64 : vector<1x128x32xf32> to vector<128x32xf32>
    %cst_33 = arith.constant dense<0.000000e+00> : vector<8x32xf32>
    %66 = tpu.matmul %63, %65, %cst_33 {dimension_numbers = #tpu.dot_dimension_numbers<[1], [0], [0], [1], [0, 0, 1, 1], [], []>} : vector<8x128xf32>, vector<128x32xf32>, vector<8x32xf32> -> vector<8x32xf32>
    %67 = arith.addf %46, %66 : vector<8x32xf32>
    %68 = vector.extract_strided_slice %23 {offsets = [0, 32], sizes = [8, 16], strides = [1, 1]} : vector<8x64xf32> to vector<8x16xf32>
    %c2 = arith.constant 2 : index
    %c0_34 = arith.constant 0 : index
    %c0_35 = arith.constant 0 : index
    %69 = vector.load %arg4[%c2, %c0_34, %c0_35] : memref<4x16x288xf32, #tpu.memory_space<vmem>>, vector<1x16x288xf32>
    %70 = vector.shape_cast %69 : vector<1x16x288xf32> to vector<16x288xf32>
    %cst_36 = arith.constant dense<0.000000e+00> : vector<8x288xf32>
    %71 = tpu.matmul %68, %70, %cst_36 {dimension_numbers = #tpu.dot_dimension_numbers<[1], [0], [0], [1], [0, 0, 1, 1], [], []>} : vector<8x16xf32>, vector<16x288xf32>, vector<8x288xf32> -> vector<8x288xf32>
    %72 = vector.extract_strided_slice %71 {offsets = [0, 0], sizes = [8, 128], strides = [1, 1]} : vector<8x288xf32> to vector<8x128xf32>
    %73 = vector.extract_strided_slice %71 {offsets = [0, 128], sizes = [8, 128], strides = [1, 1]} : vector<8x288xf32> to vector<8x128xf32>
    %74 = vector.extract_strided_slice %71 {offsets = [0, 256], sizes = [8, 32], strides = [1, 1]} : vector<8x288xf32> to vector<8x32xf32>
    %75 = arith.addf %54, %74 : vector<8x32xf32>
    %76 = arith.mulf %72, %72 : vector<8x128xf32>
    %77 = arith.mulf %73, %73 : vector<8x128xf32>
    %78 = arith.addf %76, %77 : vector<8x128xf32>
    %cst_37 = arith.constant 0.000000e+00 : f32
    %79 = vector.broadcast %cst_37 : f32 to vector<8x128xf32>
    %80 = arith.cmpf ogt, %78, %79 : vector<8x128xf32>
    %81 = math.rsqrt %78 : vector<8x128xf32>
    %82 = arith.mulf %78, %81 : vector<8x128xf32>
    %cst_38 = arith.constant 0.000000e+00 : f32
    %83 = vector.broadcast %cst_38 : f32 to vector<8x128xf32>
    %84 = arith.select %80, %82, %83 : vector<8x128xi1>, vector<8x128xf32>
    %c2_39 = arith.constant 2 : index
    %c0_40 = arith.constant 0 : index
    %c0_41 = arith.constant 0 : index
    %85 = vector.load %arg5[%c2_39, %c0_40, %c0_41] : memref<4x128x32xf32, #tpu.memory_space<vmem>>, vector<1x128x32xf32>
    %86 = vector.shape_cast %85 : vector<1x128x32xf32> to vector<128x32xf32>
    %cst_42 = arith.constant dense<0.000000e+00> : vector<8x32xf32>
    %87 = tpu.matmul %84, %86, %cst_42 {dimension_numbers = #tpu.dot_dimension_numbers<[1], [0], [0], [1], [0, 0, 1, 1], [], []>} : vector<8x128xf32>, vector<128x32xf32>, vector<8x32xf32> -> vector<8x32xf32>
    %88 = arith.addf %67, %87 : vector<8x32xf32>
    %89 = vector.extract_strided_slice %23 {offsets = [0, 48], sizes = [8, 16], strides = [1, 1]} : vector<8x64xf32> to vector<8x16xf32>
    %c3 = arith.constant 3 : index
    %c0_43 = arith.constant 0 : index
    %c0_44 = arith.constant 0 : index
    %90 = vector.load %arg4[%c3, %c0_43, %c0_44] : memref<4x16x288xf32, #tpu.memory_space<vmem>>, vector<1x16x288xf32>
    %91 = vector.shape_cast %90 : vector<1x16x288xf32> to vector<16x288xf32>
    %cst_45 = arith.constant dense<0.000000e+00> : vector<8x288xf32>
    %92 = tpu.matmul %89, %91, %cst_45 {dimension_numbers = #tpu.dot_dimension_numbers<[1], [0], [0], [1], [0, 0, 1, 1], [], []>} : vector<8x16xf32>, vector<16x288xf32>, vector<8x288xf32> -> vector<8x288xf32>
    %93 = vector.extract_strided_slice %92 {offsets = [0, 0], sizes = [8, 128], strides = [1, 1]} : vector<8x288xf32> to vector<8x128xf32>
    %94 = vector.extract_strided_slice %92 {offsets = [0, 128], sizes = [8, 128], strides = [1, 1]} : vector<8x288xf32> to vector<8x128xf32>
    %95 = vector.extract_strided_slice %92 {offsets = [0, 256], sizes = [8, 32], strides = [1, 1]} : vector<8x288xf32> to vector<8x32xf32>
    %96 = arith.addf %75, %95 : vector<8x32xf32>
    %97 = arith.mulf %93, %93 : vector<8x128xf32>
    %98 = arith.mulf %94, %94 : vector<8x128xf32>
    %99 = arith.addf %97, %98 : vector<8x128xf32>
    %cst_46 = arith.constant 0.000000e+00 : f32
    %100 = vector.broadcast %cst_46 : f32 to vector<8x128xf32>
    %101 = arith.cmpf ogt, %99, %100 : vector<8x128xf32>
    %102 = math.rsqrt %99 : vector<8x128xf32>
    %103 = arith.mulf %99, %102 : vector<8x128xf32>
    %cst_47 = arith.constant 0.000000e+00 : f32
    %104 = vector.broadcast %cst_47 : f32 to vector<8x128xf32>
    %105 = arith.select %101, %103, %104 : vector<8x128xi1>, vector<8x128xf32>
    %c3_48 = arith.constant 3 : index
    %c0_49 = arith.constant 0 : index
    %c0_50 = arith.constant 0 : index
    %106 = vector.load %arg5[%c3_48, %c0_49, %c0_50] : memref<4x128x32xf32, #tpu.memory_space<vmem>>, vector<1x128x32xf32>
    %107 = vector.shape_cast %106 : vector<1x128x32xf32> to vector<128x32xf32>
    %cst_51 = arith.constant dense<0.000000e+00> : vector<8x32xf32>
    %108 = tpu.matmul %105, %107, %cst_51 {dimension_numbers = #tpu.dot_dimension_numbers<[1], [0], [0], [1], [0, 0, 1, 1], [], []>} : vector<8x128xf32>, vector<128x32xf32>, vector<8x32xf32> -> vector<8x32xf32>
    %109 = arith.addf %88, %108 : vector<8x32xf32>
    %c0_52 = arith.constant 0 : index
    %c0_53 = arith.constant 0 : index
    %110 = vector.load %arg8[%c0_52, %c0_53] : memref<3x128xf32, #tpu.memory_space<vmem>>, vector<3x128xf32>
    %111 = vector.extract_strided_slice %110 {offsets = [0, 0], sizes = [1, 64], strides = [1, 1]} : vector<3x128xf32> to vector<1x64xf32>
    %112 = vector.extract_strided_slice %110 {offsets = [1, 0], sizes = [1, 128], strides = [1, 1]} : vector<3x128xf32> to vector<1x128xf32>
    %113 = vector.extract_strided_slice %110 {offsets = [2, 0], sizes = [1, 64], strides = [1, 1]} : vector<3x128xf32> to vector<1x64xf32>
    %114 = tpu.concatenate %96, %109 in 1 : vector<8x32xf32>, vector<8x32xf32> -> vector<8x64xf32>
    %115 = vector.broadcast %111 : vector<1x64xf32> to vector<8x64xf32>
    %116 = arith.addf %114, %115 : vector<8x64xf32>
    %cst_54 = arith.constant 0.000000e+00 : f32
    %117 = vector.broadcast %cst_54 : f32 to vector<8x64xf32>
    %118 = arith.maximumf %116, %117 : vector<8x64xf32>
    %c0_55 = arith.constant 0 : index
    %c0_56 = arith.constant 0 : index
    %119 = vector.load %arg6[%c0_55, %c0_56] : memref<64x128xf32, #tpu.memory_space<vmem>>, vector<64x128xf32>
    %cst_57 = arith.constant dense<0.000000e+00> : vector<8x128xf32>
    %120 = tpu.matmul %118, %119, %cst_57 {dimension_numbers = #tpu.dot_dimension_numbers<[1], [0], [0], [1], [0, 0, 1, 1], [], []>} : vector<8x64xf32>, vector<64x128xf32>, vector<8x128xf32> -> vector<8x128xf32>
    %121 = vector.broadcast %112 : vector<1x128xf32> to vector<8x128xf32>
    %122 = arith.addf %120, %121 : vector<8x128xf32>
    %cst_58 = arith.constant 0.000000e+00 : f32
    %123 = vector.broadcast %cst_58 : f32 to vector<8x128xf32>
    %124 = arith.maximumf %122, %123 : vector<8x128xf32>
    %c0_59 = arith.constant 0 : index
    %c0_60 = arith.constant 0 : index
    %125 = vector.load %arg7[%c0_59, %c0_60] : memref<128x64xf32, #tpu.memory_space<vmem>>, vector<128x64xf32>
    %cst_61 = arith.constant dense<0.000000e+00> : vector<8x64xf32>
    %126 = tpu.matmul %124, %125, %cst_61 {dimension_numbers = #tpu.dot_dimension_numbers<[1], [0], [0], [1], [0, 0, 1, 1], [], []>} : vector<8x128xf32>, vector<128x64xf32>, vector<8x64xf32> -> vector<8x64xf32>
    %127 = vector.broadcast %113 : vector<1x64xf32> to vector<8x64xf32>
    %128 = arith.addf %126, %127 : vector<8x64xf32>
    %129 = tpu.concatenate %116, %128 in 1 : vector<8x64xf32>, vector<8x64xf32> -> vector<8x128xf32>
    %c0_62 = arith.constant 0 : index
    %c0_63 = arith.constant 0 : index
    %130 = vector.load %arg9[%c0_62, %c0_63] : memref<8x128xf32, #tpu.memory_space<vmem>>, vector<8x128xf32>
    tpu.vector_store %arg9[%c0_62, %c0_63], %129 {strides = array<i32>} : memref<8x128xf32, #tpu.memory_space<vmem>>, vector<8x128xf32>,
    return
  }
  func.func @transform_0(%arg0: i32) -> (i32, i32) {
    %c0_i32 = arith.constant 0 : i32
    %c0_i32_0 = arith.constant 0 : i32
    return %arg0, %c0_i32 : i32, i32
  }
  func.func @transform_1(%arg0: i32) -> (i32, i32) {
    %c0_i32 = arith.constant 0 : i32
    %c0_i32_0 = arith.constant 0 : i32
    %c0_i32_1 = arith.constant 0 : i32
    return %c0_i32, %c0_i32_0 : i32, i32
  }
  func.func @transform_2(%arg0: i32) -> (i32, i32) {
    %c0_i32 = arith.constant 0 : i32
    %c0_i32_0 = arith.constant 0 : i32
    %c0_i32_1 = arith.constant 0 : i32
    return %c0_i32, %c0_i32_0 : i32, i32
  }
  func.func @transform_3(%arg0: i32) -> (i32, i32, i32) {
    %c0_i32 = arith.constant 0 : i32
    %c0_i32_0 = arith.constant 0 : i32
    %c0_i32_1 = arith.constant 0 : i32
    %c0_i32_2 = arith.constant 0 : i32
    return %c0_i32, %c0_i32_0, %c0_i32_1 : i32, i32, i32
  }
  func.func @transform_4(%arg0: i32) -> (i32, i32, i32) {
    %c0_i32 = arith.constant 0 : i32
    %c0_i32_0 = arith.constant 0 : i32
    %c0_i32_1 = arith.constant 0 : i32
    %c0_i32_2 = arith.constant 0 : i32
    return %c0_i32, %c0_i32_0, %c0_i32_1 : i32, i32, i32
  }
  func.func @transform_5(%arg0: i32) -> (i32, i32) {
    %c0_i32 = arith.constant 0 : i32
    %c0_i32_0 = arith.constant 0 : i32
    %c0_i32_1 = arith.constant 0 : i32
    return %c0_i32, %c0_i32_0 : i32, i32
  }
  func.func @transform_6(%arg0: i32) -> (i32, i32) {
    %c0_i32 = arith.constant 0 : i32
    %c0_i32_0 = arith.constant 0 : i32
    %c0_i32_1 = arith.constant 0 : i32
    return %c0_i32, %c0_i32_0 : i32, i32
  }
  func.func @transform_7(%arg0: i32) -> (i32, i32) {
    %c0_i32 = arith.constant 0 : i32
    %c0_i32_0 = arith.constant 0 : i32
    %c0_i32_1 = arith.constant 0 : i32
    return %c0_i32, %c0_i32_0 : i32, i32
  }
  func.func @transform_8(%arg0: i32) -> (i32, i32) {
    %c0_i32 = arith.constant 0 : i32
    %c0_i32_0 = arith.constant 0 : i32
    return %arg0, %c0_i32 : i32, i32
  }
}

</mosaic_0001>

<bundles_post_ra>
// kernel: tpu_custom_call.1
= control target key start
LH: loop header
LB: loop body
LE: loop exit
PB: predicated region body
PF: predicated region fallthrough
CT: control target
= control target key end

     0   :  { %13 = vsyncpa [#allocation3], 0  ;;  %s3318_s0 = inlined_call_operand.vmem [shape: f32[16,64], index: 0, kind: input, shape index: {}]   ;;  %s3319_s1 = inlined_call_operand.vmem [shape: f32[64,4], index: 1, kind: input, shape index: {}]   ;;  %s3320_s2 = inlined_call_operand.vmem [shape: f32[4,64], index: 2, kind: input, shape index: {}]   ;;  %s3321_s3 = inlined_call_operand.vmem [shape: f32[4,16,288], index: 3, kind: input, shape index: {}]   ;;  %s3322_s4 = inlined_call_operand.vmem [shape: f32[4,128,32], index: 4, kind: input, shape index: {}]   ;;  %s3323_s5 = inlined_call_operand.vmem [shape: f32[64,128], index: 5, kind: input, shape index: {}]   ;;  %s3324_s6 = inlined_call_operand.vmem [shape: f32[128,64], index: 6, kind: input, shape index: {}]   ;;  %s3325_s7 = inlined_call_operand.vmem [shape: f32[3,128], index: 7, kind: input, shape index: {}]   ;;  %s3326_s8 = inlined_call_operand.hbm [shape: f32[16,128], index: 8, kind: output, shape index: {}]  }
   0x1   :  { %15 = vsyncpa [#allocation3 + $0x1], 0  ;;  %s2740_s27 = smov 0   ;;  %s2742_s28 = smov 0  }
   0x2   :  { %s2744_s29 = smov 0   ;;  %s2746_s30 = smov 0  }
   0x3 LB: > { %s2761_s9 = sadd.s32 4294967295, %s2684_s30   ;;  %s1877_s10 = sadd.s32 4294967294, %s2684_s30   ;;  %s2684_s30 = sphi %s2746_s30, %s3332_s30   ;;  %s2680_s29 = sphi %s2744_s29, %s3331_s29   ;;  %s2676_s28 = sphi %s2742_s28, %s3330_s28   ;;  %s2672_s27 = sphi %s2740_s27, %s3329_s27  }
   0x4   : > { %s2765_s11 = sadd.s32 1, %s2684_s30   ;;  %s201_s12 = sadd.s32 1, %s2680_s29 }
   0x5   : > { %s198_s13 = ssub.s32 %s2684_s30, %s2765_s11  ;;  %p211_p0 = scmp.ne.s32.totalorder %s2680_s29, %s2676_s28 }
   0x6   : > { %p199_p1 = scmp.eq.s32.totalorder %s198_s13, 0  ;;  %p212_p2 = scmp.eq.s32.totalorder %s2761_s9, 1 }
   0x7   : > { %p217_p3 = scmp.ne.s32.totalorder %s2676_s28, %s2672_s27  ;;  %p218_p4 = scmp.eq.s32.totalorder %s1877_s10, 1 }
   0x8   : > { %s2776_s14 = scalar_select %p199_p1, %s2680_s29, %s201_s12  }
   0x9   : > { %p2778_p5 = por %p212_p2, %p211_p0  ;;  %p2782_p6 = por %p218_p4, %p217_p3 }
   0xa   : > { %p1880_p7 = scmp.ge.s32.totalorder %s2684_s30, 1  ;;  %p264_p8 = scmp.lt.s32.totalorder %s2684_s30, 3 }
   0xc   : > { %p265_p9 = pnand %p1880_p7, %p264_p8 }
   0xd   : > { %v302_v0 = vld [vmem:[%s3319_s1] sm:$0xff] (!%p265_p9)  ;;  %v303_v1 = vld [vmem:[%s3319_s1 + $0x8] sm:$0xff] (!%p265_p9)  ;;  %v304_v2 = vld [vmem:[%s3319_s1 + $0x10] sm:$0xff] (!%p265_p9)  ;;  %v2686_v3 = vmov (!%p265_p9), 0.0|0.0   ;;  %p297_p10 = scmp.lt.s32.totalorder (!%p265_p9), %s2761_s9, 1  ;;  %vm2687_vm0 = vmmov (!%p265_p9), 0  }
   0xe   : > { %268 = sbr.rel (%p265_p9) target bundleno = 1984 (0x7c0), region = 52  ;;  %2370 = vmatprep.subr.bf16.mxu0 (!%p265_p9), %v2686_v3  ;;  %v2371_v4 = vpack.c.bf16 (!%p265_p9), %v303_v1, %v302_v0  ;;  %2382 = vmatprep.subr.bf16.mxu1 (!%p265_p9), %v2686_v3  ;;  %v305_v5 = vld [vmem:[%s3319_s1 + $0x18] sm:$0xff] (!%p265_p9)  ;;  %v2688_v6 = vmov (!%p265_p9), 0.0   ;;  %v306_v8 = vld [vmem:[%s3319_s1 + $0x20] sm:$0xff] (!%p265_p9)  ;;  %v307_v9 = vld [vmem:[%s3319_s1 + $0x28] sm:$0xff] (!%p265_p9)  ;;  %vm310_vm1 = vcmask (!%p265_p9), 523264  }
   0xf   : > { %2116 = vmatprep.mubr.msk.f32.mxu0 (!%p265_p9), %vm2687_vm0, %v2688_v6  ;;  %2135 = vmatprep.mubr.msk.f32.mxu1 (!%p265_p9), %vm2687_vm0, %v2688_v6  ;;  %v2374_v7 = vpack.c.bf16 (!%p265_p9), %v305_v5, %v304_v2  ;;  %v2377_v10 = vpack.c.bf16 (!%p265_p9), %v307_v9, %v306_v8  ;;  %v308_v11 = vld [vmem:[%s3319_s1 + $0x30] sm:$0xff] (!%p265_p9)  ;;  %v309_v12 = vld [vmem:[%s3319_s1 + $0x38] sm:$0xff] (!%p265_p9)  ;;  %v466_v16 = vld [vmem:[%s3320_s2] sm:$0xf] (!%p265_p9)  ;;  %vm471_vm2 = vcmask (!%p265_p9), 1043456   ;;  %vm467_vm3 = vcmask (!%p265_p9), 31744  }
  0x10   : > { %2372 = vmatpush3.bf16.msra.mxu0 (!%p265_p9), %v2371_v4  ;;  %2384 = vmatpush3.bf16.msra.mxu1 (!%p265_p9), %v2371_v4  ;;  %v2380_v13 = vpack.c.bf16 (!%p265_p9), %v309_v12, %v308_v11  ;;  %v622_v29 = vld [vmem:[%s3321_s3 + $0x8] sm:$0xff] (!%p265_p9)  ;;  %v625_v30 = vld [vmem:[%s3321_s3 + $0x20] sm:$0xff] (!%p265_p9)  ;;  %v624_v33 = vld [vmem:[%s3321_s3 + $0x18] sm:$0xff] (!%p265_p9)  ;;  %vm627_vm5 = vcmask (!%p265_p9), 130048   ;;  %s2690_s26 = smov (!%p265_p9), 112   ;;  %s2691_s10 = smov (!%p265_p9), 96  }
  0x11   : > { %2373 = vmatprep.subr.bf16.mxu0 (!%p265_p9), %v2686_v3  ;;  %2385 = vmatprep.subr.bf16.mxu1 (!%p265_p9), %v2686_v3  ;;  %v2394_v31 = vpack.c.bf16 (!%p265_p9), %v625_v30, %v622_v29  ;;  %v621_v32 = vld [vmem:[%s3321_s3] sm:$0xff] (!%p265_p9)  ;;  %v623_v34 = vld [vmem:[%s3321_s3 + $0x10] sm:$0xff] (!%p265_p9)  ;;  %v626_v36 = vld [vmem:[%s3321_s3 + $0x28] sm:$0xff] (!%p265_p9)  ;;  %vm1614_vm10 = vcmask (!%p265_p9), 261120   ;;  %s2693_s23 = smov (!%p265_p9), 64  }
  0x12   : > { %v2396_v35 = vpack.c.bf16 (!%p265_p9), %v624_v33, %v621_v32  ;;  %v2399_v37 = vpack.c.bf16 (!%p265_p9), %v626_v36, %v623_v34  ;;  %v1892_v38 = vld [vmem:[%s3321_s3 + $0x38] sm:$0xff] (!%p265_p9)  ;;  %v1895_v39 = vld [vmem:[%s3321_s3 + $0x50] sm:$0xff] (!%p265_p9)  ;;  %v1894_v43 = vld [vmem:[%s3321_s3 + $0x48] sm:$0xff] (!%p265_p9) }
  0x13   : > { %v2401_v40 = vpack.c.bf16 (!%p265_p9), %v1895_v39, %v1892_v38  ;;  %v1891_v41 = vld [vmem:[%s3321_s3 + $0x30] sm:$0xff] (!%p265_p9)  ;;  %v1893_v44 = vld [vmem:[%s3321_s3 + $0x40] sm:$0xff] (!%p265_p9)  ;;  %v1896_v45 = vld [vmem:[%s3321_s3 + $0x58] sm:$0xff] (!%p265_p9) }
  0x14   : > { %2375 = vmatpush3.bf16.msra.mxu0 (!%p265_p9), %v2374_v7  ;;  %2387 = vmatpush3.bf16.msra.mxu1 (!%p265_p9), %v2374_v7  ;;  %v2403_v51 = vpack.c.bf16 (!%p265_p9), %v1894_v43, %v1891_v41  ;;  %v2406_v52 = vpack.c.bf16 (!%p265_p9), %v1896_v45, %v1893_v44  ;;  %v780_v53 = vld [vmem:[%s3322_s4] sm:$0xff] (!%p265_p9)  ;;  %v781_v54 = vld [vmem:[%s3322_s4 + $0x8] sm:$0xff] (!%p265_p9)  ;;  %v782_v58 = vld [vmem:[%s3322_s4 + $0x10] sm:$0xff] (!%p265_p9) }
  0x15   : > { %s298_s25 = scalar_select %p297_p10, %s2761_s9, 1  ;;  %2376 = vmatprep.subr.bf16.mxu0 %v2686_v3  ;;  %2388 = vmatprep.subr.bf16.mxu1 %v2686_v3  ;;  %v1899_v55 = vld [vmem:[%s3322_s4 + $0x80] sm:$0xff]  ;;  %v1900_v56 = vld [vmem:[%s3322_s4 + $0x88] sm:$0xff]  ;;  %v2433_v57 = vpack.c.bf16 %v781_v54, %v780_v53  ;;  %v783_v59 = vld [vmem:[%s3322_s4 + $0x18] sm:$0xff] }
  0x16   : > { %v2409_v60 = vpack.c.bf16 %v1900_v56, %v1899_v55  ;;  %v1901_v62 = vld [vmem:[%s3322_s4 + $0x90] sm:$0xff]  ;;  %v1902_v63 = vld [vmem:[%s3322_s4 + $0x98] sm:$0xff]  ;;  %v2436_v0 = vpack.c.bf16 %v783_v59, %v782_v58  ;;  %v784_v1 = vld [vmem:[%s3322_s4 + $0x20] sm:$0xff] }
  0x17   : > { %s1882_s17 = sshll.u32 %s298_s25, 3  ;;  %s2689_s25 = smov 80   ;;  %v785_v2 = vld [vmem:[%s3322_s4 + $0x28] sm:$0xff]  ;;  %v2412_v4 = vpack.c.bf16 %v1902_v63, %v1901_v62  ;;  %v1903_v5 = vld [vmem:[%s3322_s4 + $0xa0] sm:$0xff]  ;;  %v786_v9 = vld [vmem:[%s3322_s4 + $0x30] sm:$0xff] }
  0x18   : > { %s300_s24 = scalar_lea.vmem %s3318_s0, %s1882_s17  ;;  %2378 = vmatpush3.bf16.msra.mxu0 %v2377_v10  ;;  %2390 = vmatpush3.bf16.msra.mxu1 %v2377_v10  ;;  %v1904_v7 = vld [vmem:[%s3322_s4 + $0xa8] sm:$0xff]  ;;  %v2439_v8 = vpack.c.bf16 %v785_v2, %v784_v1  ;;  %v787_v10 = vld [vmem:[%s3322_s4 + $0x38] sm:$0xff]  ;;  %v1905_v12 = vld [vmem:[%s3322_s4 + $0xb0] sm:$0xff] }
  0x19   : > { %v301_v14 = vld [vmem:[%s300_s24] sm:$0xff]  ;;  %2379 = vmatprep.subr.bf16.mxu0 %v2686_v3  ;;  %2391 = vmatprep.subr.bf16.mxu1 %v2686_v3  ;;  %v2415_v11 = vpack.c.bf16 %v1904_v7, %v1903_v5  ;;  %v1908_v29 = vld [vmem:[%s3322_s4 + $0xc8] sm:$0xff]  ;;  %v1910_v32 = vld [vmem:[%s3322_s4 + $0xd8] sm:$0xff]  ;;  %s294_s24 = sand.u32 1, %s2676_s28  }
  0x1a   : > { %v384_v15 = vmul.f32 %v301_v14, %v301_v14  ;;  %v1911_v34 = vld [vmem:[%s3322_s4 + $0xe0] sm:$0xff]  ;;  %v1913_v38 = vld [vmem:[%s3322_s4 + $0xf0] sm:$0xff]  ;;  %v1914_v39 = vld [vmem:[%s3322_s4 + $0xf8] sm:$0xff]  ;;  %s1805_s19 = scalar_lea.sflag [#allocation3], %s294_s24 }
  0x1b   : > { %v1918_v44 = vld [vmem:[%s3321_s3 + $0x68] sm:$0xff]  ;;  %v1921_v45 = vld [vmem:[%s3321_s3 + $0x80] sm:$0xff]  ;;  %v1928_v54 = vld [vmem:[%s3322_s4 + $0x118] sm:$0xff] }
  0x1c   : > { %2381 = vmatpush3.bf16.msra.mxu0 %v2380_v13  ;;  %2393 = vmatpush3.bf16.msra.mxu1 %v2380_v13  ;;  %v1906_v13 = vld [vmem:[%s3322_s4 + $0xb8] sm:$0xff]  ;;  %v1929_v56 = vld [vmem:[%s3322_s4 + $0x120] sm:$0xff]  ;;  %v1919_v7 = vld [vmem:[%s3321_s3 + $0x70] sm:$0xff] }
  0x1d   : > { %2138 = vmatprep.subr.mxu0 %v2688_v6  ;;  %2143 = vmatprep.subr.mxu1 %v2688_v6  ;;  %v1920_v1 = vld [vmem:[%s3321_s3 + $0x78] sm:$0xff] }
  0x1f   : > { %2117 = vmatmul.mubr.msk.f32.vlgmr.msra.gmra.mrb[0].mxu0 %vm310_vm1, %v301_v14  ;;  %2136 = vmatmul.mubr.msk.f32.vlgmr.msra.gmra.mrb[0].mxu1 %vm310_vm1, %v384_v15  ;;  %v788_v15 = vld [vmem:[%s3322_s4 + $0x40] sm:$0xff] }
  0x20   : > { %2140 = vmatprep.mubr.msk.f32.mxu0 %vm2687_vm0, %v2688_v6  ;;  %2145 = vmatprep.mubr.msk.f32.mxu1 %vm2687_vm0, %v2688_v6 }
  0x21   : > { %2139 = vmatpush3.msk.msra.mxu0 %vm471_vm2, %v466_v16  ;;  %2144 = vmatpush3.msk.msra.mxu1 %vm471_vm2, %v466_v16  ;;  %v789_v16 = vld [vmem:[%s3322_s4 + $0x48] sm:$0xff] }
  0x22   : > { %2398 = vmatprep.subr.bf16.mxu1 %v2686_v3  ;;  %2395 = vmatprep.subr.bf16.mxu0 %v2394_v31  ;;  %v1909_v31 = vld [vmem:[%s3322_s4 + $0xd0] sm:$0xff] }
  0x23   : > { %v2424_v33 = vpack.c.bf16 %v1910_v32, %v1909_v31  ;;  %v1938_v31 = vld [vmem:[%s3322_s4 + $0x168] sm:$0xff] }
  0xf2   : > { %v380_v17 = vpop.f32.mrb[0].mxu0  ;;  %v454_v18 = vpop.f32.mrb[0].mxu1 }
  0xf3   : > { %v458_v19 = vmul.f32 0.0625, %v380_v17  ;;  %v2118_v20 = vpop.f32.mrb[1].mxu0  ;;  %v459_v21 = vmul.f32 0.0625, %v454_v18  ;;  %v2137_v22 = vpop.f32.mrb[1].mxu1  ;;  %v2418_v17 = vpack.c.bf16 %v1906_v13, %v1905_v12  ;;  %v2445_v18 = vpack.c.bf16 %v789_v16, %v788_v15  ;;  %v1942_v13 = vld [vmem:[%s3321_s3 + $0x90] sm:$0xff] }
  0xf4   : > { %v791_v20 = vld [vmem:[%s3322_s4 + $0x58] sm:$0xff]  ;;  %v792_v22 = vld [vmem:[%s3322_s4 + $0x60] sm:$0xff] }
  0xf5   : > { %v460_v23 = vmul.f32 %v458_v19, %v458_v19 }
  0xf7   : > { %v461_v24 = vsub.f32 %v459_v21, %v460_v23  ;;  %v793_v23 = vld [vmem:[%s3322_s4 + $0x68] sm:$0xff] }
  0xf9   : > { %v462_v25 = vmax.f32 %v461_v24, 0.0  ;;  %v2451_v24 = vpack.c.bf16 %v793_v23, %v792_v22  ;;  %v1932_v22 = vld [vmem:[%s3322_s4 + $0x138] sm:$0xff] }
  0xfb   : > { %2612 = vrsqrt.f32 %v462_v25  ;;  %vm463_vm4 = vcmp.le.f32.partialorder %v462_v25, 0.0  ;;  %v794_v25 = vld [vmem:[%s3322_s4 + $0x70] sm:$0xff] }
 0x105   : > { %v2613_v26 = vpop.eup %2612 }
 0x106   : > { %v465_v27 = vsel %vm463_vm4, 1.0, %v2613_v26  ;;  %v795_v26 = vld [vmem:[%s3322_s4 + $0x78] sm:$0xff] }
 0x107   : > { %2141 = vmatmul.mubr.msk.f32.vlgmr.msra.gmra.mrb[2].mxu0 %vm467_vm3, %v465_v27  ;;  %v545_v28 = vmul.f32 %v465_v27, %v458_v19  ;;  %v790_v19 = vld [vmem:[%s3322_s4 + $0x50] sm:$0xff]  ;;  %v2454_v27 = vpack.c.bf16 %v795_v26, %v794_v25  ;;  %v1934_v25 = vld [vmem:[%s3322_s4 + $0x148] sm:$0xff] }
 0x108   : > { %695 = vmatprep.mubr.f32.mxu0 %v2688_v6  ;;  %2397 = vmatpush1.bf16.msra.mxu0 %v2396_v35  ;;  %v2448_v21 = vpack.c.bf16 %v791_v20, %v790_v19  ;;  %v1912_v35 = vld [vmem:[%s3322_s4 + $0xe8] sm:$0xff] }
 0x109   : > { %2146 = vmatmul.mubr.msk.f32.vlgmr.msra.gmra.mrb[2].mxu1 %vm467_vm3, %v545_v28  ;;  %2402 = vmatprep.subr.bf16.mxu0 %v2401_v40  ;;  %v1907_v28 = vld [vmem:[%s3322_s4 + $0xc0] sm:$0xff]  ;;  %v2427_v36 = vpack.c.bf16 %v1912_v35, %v1911_v34  ;;  %v1940_v34 = vld [vmem:[%s3322_s4 + $0x178] sm:$0xff] }
 0x10a   : > { %2152 = vmatprep.mubr.msk.f32.mxu1 %vm2687_vm0, %v2688_v6  ;;  %2400 = vmatpush3.bf16.msra.mxu1 %v2399_v37  ;;  %v2421_v30 = vpack.c.bf16 %v1908_v29, %v1907_v28  ;;  %v1936_v28 = vld [vmem:[%s3322_s4 + $0x158] sm:$0xff] }
 0x10b   : > { %2405 = vmatprep.subr.bf16.mxu1 %v2686_v3 }
 0x1da   : > { %v541_v42 = vpop.f32.mrb[2].mxu0 }
 0x1db   : > { %v619_v46 = vmul.f32 %v541_v42, %v301_v14  ;;  %v2142_v47 = vpop.f32.mrb[3].mxu0  ;;  %v2442_v14 = vpack.c.bf16 %v787_v10, %v786_v9  ;;  %v2430_v42 = vpack.c.bf16 %v1914_v39, %v1913_v38  ;;  %v1943_v9 = vld [vmem:[%s3321_s3 + $0x98] sm:$0xff]  ;;  %v1946_v10 = vld [vmem:[%s3321_s3 + $0xb0] sm:$0xff] }
 0x1dc   : > { %v615_v48 = vpop.f32.mrb[2].mxu1  ;;  %v2456_v47 = vpack.c.bf16 %v1921_v45, %v1918_v44  ;;  %v2487_v12 = vpack.c.bf16 %v1946_v10, %v1943_v9  ;;  %v1963_v9 = vld [vmem:[%s3322_s4 + $0x1e8] sm:$0xff] }
 0x1dd   : > { %v620_v49 = vsub.f32 %v619_v46, %v615_v48  ;;  %v2147_v50 = vpop.f32.mrb[3].mxu1 }
 0x1de   : > { %v1925_v50 = vld [vmem:[%s3322_s4 + $0x100] sm:$0xff] }
 0x1df   : > { %1368 = vrot.lane.b32.xlu1 %v620_v49, %s2689_s25  ;;  %803 = vrot.lane.b32.xlu0 %v620_v49, %s2690_s26  ;;  %s1881_s25 = sshll.u32 %s294_s24, 3  ;;  %s1969_s26 = sshll.u32 %s2761_s9, 7 }
 0x1e0   : > { %1889 = vmatmul.mubr.msk.f32.vlgmr.msra.gmra.mrb[4].mxu0 %vm627_vm5, %v620_v49  ;;  %2153 = vmatmul.mubr.msk.f32.vlgmr.msra.gmra.mrb[4].mxu1 %vm627_vm5, %v620_v49  ;;  %s3274_s18 = scalar_lea.hbm %s3326_s8, %s1969_s26  ;;  %s2694_s9 = smov [#allocation2]  }
 0x1e1   : > { %2404 = vmatpush1.bf16.msra.mxu0 %v2403_v51  ;;  %2407 = vmatpush3.bf16.msra.mxu1 %v2406_v52  ;;  %v1926_v51 = vld [vmem:[%s3322_s4 + $0x108] sm:$0xff]  ;;  %v1927_v52 = vld [vmem:[%s3322_s4 + $0x110] sm:$0xff]  ;;  %s2626_s21 = sshll.u32 %s2694_s9, 4  ;;  %s2627_s21 = int_to_ptr.vmem [resolvable:$false] %s2626_s21 }
 0x1e2   : > { %871 = vmatprep.mubr.f32.mxu0 %v2688_v6  ;;  %2159 = vmatprep.mubr.msk.f32.mxu1 %vm2687_vm0, %v2688_v6  ;;  %v2464_v53 = vpack.c.bf16 %v1926_v51, %v1925_v50  ;;  %v2467_v55 = vpack.c.bf16 %v1928_v54, %v1927_v52  ;;  %v1950_v50 = vld [vmem:[%s3322_s4 + $0x180] sm:$0xff]  ;;  %v1951_v51 = vld [vmem:[%s3322_s4 + $0x188] sm:$0xff]  ;;  %s2628_s22 = scalar_lea.vmem %s2627_s21, 256 }
 0x1e3   : > { %1120 = vrot.lane.b32.xlu0 %v620_v49, %s2691_s10  ;;  %2432 = vmatprep.subr.bf16.mxu0 %v2686_v3  ;;  %s2692_s10 = smov 32  }
 0x1e4   : > { %2408 = vmatprep.subr.bf16.mxu1 %v2686_v3 }
 0x251   : > { %v804_v61 = vpop.permute.xlu0 %803  ;;  %v1369_v20 = vpop.permute.xlu1 %1368 }
 0x252   : > { %1897 = vmatmul.mubr.msk.f32.vlgmr.msra.gmra.mrb[6].mxu0 %vm627_vm5, %v804_v61  ;;  %2160 = vmatmul.mubr.msk.f32.vlgmr.msra.gmra.mrb[4].mxu1 %vm627_vm5, %v804_v61 }
 0x253   : > { %2434 = vmatpush3.bf16.msra.mxu0 %v2433_v57  ;;  %2229 = vmatprep.mubr.msk.f32.mxu0 %vm2687_vm0, %v2688_v6  ;;  %v1930_v57 = vld [vmem:[%s3322_s4 + $0x128] sm:$0xff] }
 0x254   : > { %2435 = vmatprep.subr.bf16.mxu0 %v2686_v3  ;;  %2410 = vmatpush3.bf16.msra.mxu1 %v2409_v60  ;;  %v2470_v58 = vpack.c.bf16 %v1930_v57, %v1929_v56  ;;  %v1953_v56 = vld [vmem:[%s3322_s4 + $0x198] sm:$0xff] }
 0x255   : > { %2411 = vmatprep.subr.bf16.mxu1 %v2686_v3  ;;  %2194 = vmatprep.mubr.msk.f32.mxu1 %vm2687_vm0, %v2688_v6  ;;  %v1121_v15 = vpop.permute.xlu0 %1120 }
 0x257   : > { %2437 = vmatpush3.bf16.msra.mxu0 %v2436_v0  ;;  %v1917_v0 = vld [vmem:[%s3321_s3 + $0x60] sm:$0xff] }
 0x258   : > { %2438 = vmatprep.subr.bf16.mxu0 %v2686_v3  ;;  %2413 = vmatpush3.bf16.msra.mxu1 %v2412_v4  ;;  %v2458_v4 = vpack.c.bf16 %v1920_v1, %v1917_v0  ;;  %v1958_v0 = vld [vmem:[%s3322_s4 + $0x1c0] sm:$0xff]  ;;  %v1959_v1 = vld [vmem:[%s3322_s4 + $0x1c8] sm:$0xff] }
 0x259   : > { %2414 = vmatprep.subr.bf16.mxu1 %v2686_v3 }
 0x25b   : > { %2440 = vmatpush3.bf16.msra.mxu0 %v2439_v8  ;;  %v1922_v8 = vld [vmem:[%s3321_s3 + $0x88] sm:$0xff] }
 0x25c   : > { %2441 = vmatprep.subr.bf16.mxu0 %v2686_v3  ;;  %2416 = vmatpush3.bf16.msra.mxu1 %v2415_v11  ;;  %v2461_v11 = vpack.c.bf16 %v1922_v8, %v1919_v7  ;;  %v1962_v8 = vld [vmem:[%s3322_s4 + $0x1e0] sm:$0xff] }
 0x25d   : > { %2417 = vmatprep.subr.bf16.mxu1 %v2686_v3  ;;  %v2513_v10 = vpack.c.bf16 %v1963_v9, %v1962_v8 }
 0x25f   : > { %2443 = vmatpush3.bf16.msra.mxu0 %v2442_v14  ;;  %v1945_v14 = vld [vmem:[%s3321_s3 + $0xa8] sm:$0xff] }
 0x260   : > { %2444 = vmatprep.subr.bf16.mxu0 %v2686_v3  ;;  %2419 = vmatpush3.bf16.msra.mxu1 %v2418_v17  ;;  %v2489_v16 = vpack.c.bf16 %v1945_v14, %v1942_v13  ;;  %v1944_v17 = vld [vmem:[%s3321_s3 + $0xa0] sm:$0xff] }
 0x261   : > { %2420 = vmatprep.subr.bf16.mxu1 %v2686_v3 }
 0x263   : > { %2446 = vmatpush3.bf16.msra.mxu0 %v2445_v18  ;;  %v1947_v18 = vld [vmem:[%s3321_s3 + $0xb8] sm:$0xff] }
 0x264   : > { %2447 = vmatprep.subr.bf16.mxu0 %v2686_v3  ;;  %2422 = vmatpush3.bf16.msra.mxu1 %v2421_v30  ;;  %v2492_v19 = vpack.c.bf16 %v1947_v18, %v1944_v17  ;;  %v1937_v30 = vld [vmem:[%s3322_s4 + $0x160] sm:$0xff]  ;;  %v1623_v17 = vld [vmem:[%s3323_s5 + $0x8] sm:$0xff]  ;;  %v1624_v18 = vld [vmem:[%s3323_s5 + $0x10] sm:$0xff] }
 0x265   : > { %2423 = vmatprep.subr.bf16.mxu1 %v2686_v3  ;;  %v2482_v32 = vpack.c.bf16 %v1938_v31, %v1937_v30  ;;  %v1616_v31 = vlaneseq }
 0x267   : > { %2449 = vmatpush3.bf16.msra.mxu0 %v2448_v21  ;;  %v1931_v21 = vld [vmem:[%s3322_s4 + $0x130] sm:$0xff] }
 0x268   : > { %2450 = vmatprep.subr.bf16.mxu0 %v2686_v3  ;;  %2425 = vmatpush3.bf16.msra.mxu1 %v2424_v33  ;;  %v2473_v23 = vpack.c.bf16 %v1932_v22, %v1931_v21  ;;  %v1939_v33 = vld [vmem:[%s3322_s4 + $0x170] sm:$0xff]  ;;  %v1626_v22 = vld [vmem:[%s3323_s5 + $0x20] sm:$0xff] }
 0x269   : > { %2426 = vmatprep.subr.bf16.mxu1 %v2686_v3  ;;  %v2485_v35 = vpack.c.bf16 %v1940_v34, %v1939_v33  ;;  %v1609_v34 = vld [vmem:[%s3325_s7] sm:$0x7] }
 0x26b   : > { %2452 = vmatpush3.bf16.msra.mxu0 %v2451_v24  ;;  %v1933_v24 = vld [vmem:[%s3322_s4 + $0x140] sm:$0xff] }
 0x26c   : > { %2453 = vmatprep.subr.bf16.mxu0 %v2686_v3  ;;  %2428 = vmatpush3.bf16.msra.mxu1 %v2427_v36  ;;  %v2476_v26 = vpack.c.bf16 %v1934_v25, %v1933_v24  ;;  %v1628_v25 = vld [vmem:[%s3323_s5 + $0x30] sm:$0xff] }
 0x26d   : > { %2429 = vmatprep.subr.bf16.mxu1 %v2686_v3 }
 0x26f   : > { %2455 = vmatpush3.bf16.msra.mxu0 %v2454_v27  ;;  %v1935_v27 = vld [vmem:[%s3322_s4 + $0x150] sm:$0xff] }
 0x270   : > { %2463 = vmatprep.subr.bf16.mxu0 %v2686_v3  ;;  %2431 = vmatpush3.bf16.msra.mxu1 %v2430_v42  ;;  %v2479_v29 = vpack.c.bf16 %v1936_v28, %v1935_v27 }
 0x271   : > { %2457 = vmatprep.subr.bf16.mxu1 %v2456_v47 }
 0x2b3   : > { %v697_v37 = vpop.f32.mrb[4].mxu0 }
 0x2b4   : > { %v773_v40 = vmul.f32 %v697_v37, %v697_v37  ;;  %v699_v41 = vpop.f32.mrb[5].mxu0 }
 0x2b5   : > { %v774_v43 = vmul.f32 %v699_v41, %v699_v41 }
 0x2b7   : > { %v775_v46 = vadd.f32 %v774_v43, %v773_v40 }
 0x2b9   : > { %2614 = vrsqrt.f32 %v775_v46  ;;  %vm776_vm6 = vcmp.gt.f32.partialorder %v775_v46, 0.0 }
 0x2c3   : > { %v2615_v48 = vpop.eup %2614 }
 0x2c4   : > { %v778_v49 = vmul.f32 %v2615_v48, %v775_v46 }
 0x2c6   : > { %2230 = vmatmul.mubr.msk.f32.vlgmr.msra.gmra.mrb[8].mxu0 %vm776_vm6, %v778_v49 }
 0x2c7   : > { %2271 = vmatprep.mubr.msk.f32.mxu0 %vm2687_vm0, %v2688_v6  ;;  %2465 = vmatpush3.bf16.msra.mxu0 %v2464_v53  ;;  %v2495_v53 = vpack.c.bf16 %v1951_v51, %v1950_v50  ;;  %v1716_v51 = vld [vmem:[%s3324_s6 + $0x40] sm:$0xff] }
 0x2c8   : > { %2466 = vmatprep.subr.bf16.mxu0 %v2686_v3 }
 0x2cb   : > { %2468 = vmatpush3.bf16.msra.mxu0 %v2467_v55  ;;  %v1952_v55 = vld [vmem:[%s3322_s4 + $0x190] sm:$0xff] }
 0x2cc   : > { %2469 = vmatprep.subr.bf16.mxu0 %v2686_v3  ;;  %v2498_v57 = vpack.c.bf16 %v1953_v56, %v1952_v55  ;;  %v1719_v55 = vld [vmem:[%s3324_s6 + $0x58] sm:$0xff] }
 0x2cf   : > { %2471 = vmatpush3.bf16.msra.mxu0 %v2470_v58  ;;  %v1954_v58 = vld [vmem:[%s3322_s4 + $0x1a0] sm:$0xff] }
 0x2d0   : > { %2472 = vmatprep.subr.bf16.mxu0 %v2686_v3 }
 0x2d3   : > { %2474 = vmatpush3.bf16.msra.mxu0 %v2473_v23  ;;  %v1627_v23 = vld [vmem:[%s3323_s5 + $0x28] sm:$0xff] }
 0x2d4   : > { %2475 = vmatprep.subr.bf16.mxu0 %v2686_v3  ;;  %v2525_v24 = vpack.c.bf16 %v1627_v23, %v1626_v22 }
 0x2d7   : > { %2477 = vmatpush3.bf16.msra.mxu0 %v2476_v26  ;;  %v1629_v26 = vld [vmem:[%s3323_s5 + $0x38] sm:$0xff] }
 0x2d8   : > { %2478 = vmatprep.subr.bf16.mxu0 %v2686_v3  ;;  %v2528_v27 = vpack.c.bf16 %v1629_v26, %v1628_v25 }
 0x2db   : > { %2480 = vmatpush3.bf16.msra.mxu0 %v2479_v29 }
 0x2dc   : > { %2481 = vmatprep.subr.bf16.mxu0 %v2686_v3 }
 0x2df   : > { %2483 = vmatpush3.bf16.msra.mxu0 %v2482_v32  ;;  %v1617_v32 = vshrl.u32 %v1616_v31, 7 }
 0x2e0   : > { %2484 = vmatprep.subr.bf16.mxu0 %v2686_v3 }
 0x2e1   : > { %v1618_v33 = vsub.s32 0, %v1617_v32 }
 0x2e3   : > { %2486 = vmatpush3.bf16.msra.mxu0 %v2485_v35  ;;  %v1619_v35 = vrot.slane %v1609_v34, %v1618_v33 }
 0x2e4   : > { %2494 = vmatprep.subr.bf16.mxu0 %v2686_v3 }
 0x325   : > { %v873_v59 = vpop.f32.mrb[6].mxu0 }
 0x326   : > { %v949_v60 = vmul.f32 %v873_v59, %v873_v59  ;;  %v875_v61 = vpop.f32.mrb[7].mxu0  ;;  %v1955_v59 = vld [vmem:[%s3322_s4 + $0x1a8] sm:$0xff] }
 0x327   : > { %v950_v62 = vmul.f32 %v875_v61, %v875_v61  ;;  %v1956_v61 = vld [vmem:[%s3322_s4 + $0x1b0] sm:$0xff] }
 0x329   : > { %v951_v63 = vadd.f32 %v950_v62, %v949_v60  ;;  %v2501_v60 = vpack.c.bf16 %v1955_v59, %v1954_v58  ;;  %v1957_v62 = vld [vmem:[%s3322_s4 + $0x1b8] sm:$0xff]  ;;  %v1721_v58 = vld [vmem:[%s3324_s6 + $0x68] sm:$0xff] }
 0x32b   : > { %2616 = vrsqrt.f32 %v951_v63  ;;  %vm952_vm7 = vcmp.gt.f32.partialorder %v951_v63, 0.0 }
 0x335   : > { %v2617_v2 = vpop.eup %2616 }
 0x336   : > { %v954_v5 = vmul.f32 %v2617_v2, %v951_v63  ;;  %v2504_v63 = vpack.c.bf16 %v1957_v62, %v1956_v61  ;;  %v2507_v2 = vpack.c.bf16 %v1959_v1, %v1958_v0  ;;  %v1723_v61 = vld [vmem:[%s3324_s6 + $0x78] sm:$0xff] }
 0x338   : > { %2195 = vmatmul.mubr.msk.f32.vlgmr.msra.gmra.mrb[6].mxu1 %vm952_vm7, %v954_v5  ;;  %v1961_v5 = vld [vmem:[%s3322_s4 + $0x1d8] sm:$0xff] }
 0x339   : > { %2459 = vmatpush1.bf16.msra.mxu1 %v2458_v4  ;;  %1188 = vmatprep.mubr.f32.mxu1 %v2688_v6  ;;  %v1960_v4 = vld [vmem:[%s3322_s4 + $0x1d0] sm:$0xff] }
 0x33a   : > { %2460 = vmatprep.subr.bf16.mxu1 %v2686_v3  ;;  %v2510_v7 = vpack.c.bf16 %v1961_v5, %v1960_v4 }
 0x33c   : > { %1923 = vmatmul.mubr.msk.f32.vlgmr.msra.gmra.mrb[8].mxu1 %vm627_vm5, %v1121_v15 }
 0x33d   : > { %2462 = vmatpush3.bf16.msra.mxu1 %v2461_v11  ;;  %2236 = vmatprep.mubr.msk.f32.mxu1 %vm2687_vm0, %v2688_v6  ;;  %v1964_v11 = vld [vmem:[%s3322_s4 + $0x1f0] sm:$0xff] }
 0x33e   : > { %2488 = vmatprep.subr.bf16.mxu1 %v2487_v12  ;;  %v1965_v12 = vld [vmem:[%s3322_s4 + $0x1f8] sm:$0xff] }
 0x33f   : > { %v2516_v13 = vpack.c.bf16 %v1965_v12, %v1964_v11 }
 0x340   : > { %2237 = vmatmul.mubr.msk.f32.vlgmr.msra.gmra.mrb[4].mxu1 %vm627_vm5, %v1121_v15 }
 0x341   : > { %2490 = vmatpush1.bf16.msra.mxu1 %v2489_v16  ;;  %1436 = vmatprep.mubr.f32.mxu1 %v2688_v6  ;;  %v1622_v16 = vld [vmem:[%s3323_s5] sm:$0xff] }
 0x342   : > { %2491 = vmatprep.subr.bf16.mxu1 %v2686_v3 }
 0x344   : > { %1948 = vmatmul.mubr.msk.f32.vlgmr.msra.gmra.mrb[10].mxu1 %vm627_vm5, %v1369_v20 }
 0x345   : > { %2493 = vmatpush3.bf16.msra.mxu1 %v2492_v19  ;;  %2278 = vmatprep.mubr.msk.f32.mxu1 %vm2687_vm0, %v2688_v6  ;;  %v2519_v19 = vpack.c.bf16 %v1623_v17, %v1622_v16 }
 0x346   : > { %2518 = vmatprep.subr.bf16.mxu1 %v2686_v3 }
 0x348   : > { %2279 = vmatmul.mubr.msk.f32.vlgmr.msra.gmra.mrb[4].mxu1 %vm627_vm5, %v1369_v20  ;;  %v1625_v20 = vld [vmem:[%s3323_s5 + $0x18] sm:$0xff] }
 0x349   : > { %2332 = vmatprep.mubr.msk.f32.mxu1 %vm2687_vm0, %v2688_v6  ;;  %2520 = vmatpush3.bf16.msra.mxu1 %v2519_v19  ;;  %v2522_v21 = vpack.c.bf16 %v1625_v20, %v1624_v18 }
 0x34a   : > { %2521 = vmatprep.subr.bf16.mxu1 %v2686_v3 }
 0x34d   : > { %2523 = vmatpush3.bf16.msra.mxu1 %v2522_v21 }
 0x34e   : > { %2524 = vmatprep.subr.bf16.mxu1 %v2686_v3 }
 0x351   : > { %2526 = vmatpush3.bf16.msra.mxu1 %v2525_v24 }
 0x352   : > { %2527 = vmatprep.subr.bf16.mxu1 %v2686_v3 }
 0x355   : > { %2529 = vmatpush3.bf16.msra.mxu1 %v2528_v27 }
 0x356   : > { %2530 = vmatprep.subr.bf16.mxu1 %v2686_v3 }
 0x40b   : > { %v3114_v36 = vpop.f32.mrb[6].mxu1 }
 0x40c   : > { %v2196_v37 = vpop.f32.mrb[7].mxu1 }
 0x40f   : > { %v1190_v38 = vpop.f32.mrb[8].mxu1 }
 0x410   : > { %v1266_v39 = vmul.f32 %v1190_v38, %v1190_v38  ;;  %v1192_v40 = vpop.f32.mrb[9].mxu1  ;;  %v1708_v38 = vld [vmem:[%s3324_s6] sm:$0xff] }
 0x411   : > { %v1267_v41 = vmul.f32 %v1192_v40, %v1192_v40 }
 0x413   : > { %v1268_v42 = vadd.f32 %v1267_v41, %v1266_v39 }
 0x415   : > { %2618 = vrsqrt.f32 %v1268_v42  ;;  %vm1269_vm8 = vcmp.gt.f32.partialorder %v1268_v42, 0.0 }
 0x417   : > { %v1438_v43 = vpop.f32.mrb[10].mxu1 }
 0x418   : > { %v1514_v44 = vmul.f32 %v1438_v43, %v1438_v43  ;;  %v1440_v45 = vpop.f32.mrb[11].mxu1  ;;  %v1710_v43 = vld [vmem:[%s3324_s6 + $0x10] sm:$0xff] }
 0x419   : > { %v1515_v46 = vmul.f32 %v1440_v45, %v1440_v45 }
 0x41b   : > { %v1516_v47 = vadd.f32 %v1515_v46, %v1514_v44  ;;  %v3116_v48 = vpop.f32.mrb[4].mxu1  ;;  %v1711_v44 = vld [vmem:[%s3324_s6 + $0x18] sm:$0xff]  ;;  %v1712_v46 = vld [vmem:[%s3324_s6 + $0x20] sm:$0xff] }
 0x41c   : > { %v2280_v49 = vpop.f32.mrb[5].mxu1  ;;  %v2534_v45 = vpack.c.bf16 %v1711_v44, %v1710_v43 }
 0x41d   : > { %2620 = vrsqrt.f32 %v1516_v47  ;;  %vm1517_vm9 = vcmp.gt.f32.partialorder %v1516_v47, 0.0  ;;  %v1714_v49 = vld [vmem:[%s3324_s6 + $0x30] sm:$0xff] }
 0x41f   : > { %v2619_v52 = vpop.eup %2618 }
 0x420   : > { %v1271_v54 = vmul.f32 %v2619_v52, %v1268_v42  ;;  %v1717_v52 = vld [vmem:[%s3324_s6 + $0x48] sm:$0xff] }
 0x422   : > { %2272 = vmatmul.mubr.msk.f32.vlgmr.msra.gmra.mrb[8].mxu0 %vm1269_vm8, %v1271_v54  ;;  %v1718_v54 = vld [vmem:[%s3324_s6 + $0x50] sm:$0xff] }
 0x423   : > { %2496 = vmatpush3.bf16.msra.mxu0 %v2495_v53  ;;  %2313 = vmatprep.mubr.msk.f32.mxu0 %vm2687_vm0, %v2688_v6  ;;  %v2543_v53 = vpack.c.bf16 %v1717_v52, %v1716_v51  ;;  %v2546_v56 = vpack.c.bf16 %v1719_v55, %v1718_v54 }
 0x424   : > { %2497 = vmatprep.subr.bf16.mxu0 %v2686_v3 }
 0x427   : > { %2499 = vmatpush3.bf16.msra.mxu0 %v2498_v57  ;;  %v2621_v14 = vpop.eup %2620  ;;  %v1720_v57 = vld [vmem:[%s3324_s6 + $0x60] sm:$0xff] }
 0x428   : > { %2500 = vmatprep.subr.bf16.mxu0 %v2686_v3  ;;  %v1519_v15 = vmul.f32 %v2621_v14, %v1516_v47  ;;  %v1713_v47 = vld [vmem:[%s3324_s6 + $0x28] sm:$0xff]  ;;  %v2549_v59 = vpack.c.bf16 %v1721_v58, %v1720_v57 }
 0x42b   : > { %2502 = vmatpush3.bf16.msra.mxu0 %v2501_v60  ;;  %v1722_v60 = vld [vmem:[%s3324_s6 + $0x70] sm:$0xff] }
 0x42c   : > { %2503 = vmatprep.subr.bf16.mxu0 %v2686_v3  ;;  %v2552_v62 = vpack.c.bf16 %v1723_v61, %v1722_v60 }
 0x42f   : > { %2505 = vmatpush3.bf16.msra.mxu0 %v2504_v63  ;;  %v1632_v63 = vsub.s32 1, %v1617_v32 }
 0x430   : > { %2506 = vmatprep.subr.bf16.mxu0 %v2686_v3 }
 0x431   : > { %v1633_v0 = vrot.slane %v1609_v34, %v1632_v63 }
 0x433   : > { %2508 = vmatpush3.bf16.msra.mxu0 %v2507_v2 }
 0x434   : > { %2509 = vmatprep.subr.bf16.mxu0 %v2686_v3 }
 0x437   : > { %2511 = vmatpush3.bf16.msra.mxu0 %v2510_v7 }
 0x438   : > { %2512 = vmatprep.subr.bf16.mxu0 %v2686_v3 }
 0x43b   : > { %2514 = vmatpush3.bf16.msra.mxu0 %v2513_v10 }
 0x43c   : > { %2515 = vmatprep.subr.bf16.mxu0 %v2686_v3 }
 0x43f   : > { %2517 = vmatpush3.bf16.msra.mxu0 %v2516_v13 }
 0x442   : > { %2314 = vmatmul.mubr.msk.f32.vlgmr.msra.gmra.mrb[8].mxu0 %vm1517_vm9, %v1519_v15 }
 0x515   : > { %v1604_v28 = vpop.f32.mrb[8].mxu0 }
 0x516   : > { %v2554_v29 = vadd.f32 %v1604_v28, %v3114_v36  ;;  %v2315_v30 = vpop.f32.mrb[9].mxu0  ;;  %v1709_v36 = vld [vmem:[%s3324_s6 + $0x8] sm:$0xff] }
 0x517   : > { %v2531_v41 = vpack.c.bf16 %v1709_v36, %v1708_v38 }
 0x518   : > { %1611 = vrot.lane.b32.xlu1 %v2554_v29, %s2692_s10  ;;  %s296_s10 = scalar_lea.vmem [#allocation2], %s1881_s25 }
 0x519   : > { %s1818_s12 = sshll.u32 %s296_s10, 4  ;;  %s3276_s12 = int_to_ptr.vmem [resolvable:$true] %s1818_s12 }
 0x51a   : > { %s2622_s20 = scalar_lea.vmem %s3276_s12, 128  ;;  %p2629_p0 = scmp.lt.s32.totalorder %s3276_s12, %s2627_s21 }
 0x51b   : > { %p2623_p11 = scmp.ne.s32.totalorder %s3276_s12, %s2622_s20  ;;  %p2630_p1 = scmp.lt.s32.totalorder %s2628_s22, %s2622_s20 }
 0x51d   : > { %p2624_p12 = pnand %p2623_p11, %p2778_p5  ;;  %p2631_p2 = por %p2630_p1, %p2629_p0 }
 0x51f   : > { %p2625_p13 = pneg %p2624_p12 }
 0x521   : > { %p2632_p3 = pnand %p2631_p2, %p2625_p13 }
 0x58a   : > { %v1612_v37 = vpop.permute.xlu1 %1611 }
 0x58b   : > { %v1615_v39 = vsel %vm1614_vm10, %v3116_v48, %v1612_v37  ;;  %v2537_v48 = vpack.c.bf16 %v1713_v47, %v1712_v46 }
 0x58c   : > { %v3214_v40 = vadd.f32 %v1619_v35, %v1615_v39 }
 0x58e   : > { %v1621_v42 = vmax.f32 %v3214_v40, 0.0 }
 0x590   : > { %2333 = vmatmul.mubr.msk.f32.vlgmr.msra.gmra.mrb[12].mxu1 %vm310_vm1, %v1621_v42 }
 0x591   : > { %2532 = vmatpush3.bf16.msra.mxu1 %v2531_v41  ;;  %2367 = vmatprep.mubr.msk.f32.mxu1 %vm2687_vm0, %v2688_v6  ;;  %v1715_v6 = vld [vmem:[%s3324_s6 + $0x38] sm:$0xff] }
 0x592   : > { %2533 = vmatprep.subr.bf16.mxu1 %v2686_v3  ;;  %v2540_v50 = vpack.c.bf16 %v1715_v6, %v1714_v49 }
 0x595   : > { %2535 = vmatpush3.bf16.msra.mxu1 %v2534_v45 }
 0x596   : > { %2536 = vmatprep.subr.bf16.mxu1 %v2686_v3 }
 0x599   : > { %2538 = vmatpush3.bf16.msra.mxu1 %v2537_v48 }
 0x59a   : > { %2539 = vmatprep.subr.bf16.mxu1 %v2686_v3 }
 0x59d   : > { %2541 = vmatpush3.bf16.msra.mxu1 %v2540_v50 }
 0x59e   : > { %2542 = vmatprep.subr.bf16.mxu1 %v2686_v3 }
 0x5a1   : > { %2544 = vmatpush3.bf16.msra.mxu1 %v2543_v53 }
 0x5a2   : > { %2545 = vmatprep.subr.bf16.mxu1 %v2686_v3 }
 0x5a5   : > { %2547 = vmatpush3.bf16.msra.mxu1 %v2546_v56 }
 0x5a6   : > { %2548 = vmatprep.subr.bf16.mxu1 %v2686_v3 }
 0x5a9   : > { %2550 = vmatpush3.bf16.msra.mxu1 %v2549_v59 }
 0x5aa   : > { %2551 = vmatprep.subr.bf16.mxu1 %v2686_v3  ;;  %v1726_v3 = vsub.s32 2, %v1617_v32 }
 0x5ac   : > { %v1727_v7 = vrot.slane %v1609_v34, %v1726_v3 }
 0x5ad   : > { %2553 = vmatpush3.bf16.msra.mxu1 %v2552_v62 }
 0x663   : > { %v1703_v1 = vpop.f32.mrb[12].mxu1 }
 0x664   : > { %v1704_v2 = vadd.f32 %v1703_v1, %v1633_v0  ;;  %v2334_v4 = vpop.f32.mrb[13].mxu1 }
 0x666   : > { %v1707_v5 = vmax.f32 %v1704_v2, 0.0 }
 0x668   : > { %2368 = vmatmul.mubr.f32.vlgmr.msra.gmra.mrb[14].mxu1 %v1707_v5 }
 0x73b   : > { %v1794_v8 = vpop.f32.mrb[14].mxu1 }
 0x73c   : > { %v1795_v9 = vadd.f32 %v1794_v8, %v1727_v7  ;;  %v2369_v10 = vpop.f32.mrb[15].mxu1 }
 0x73e   : > { %1799 = vrot.lane.b32.xlu0 %v1795_v9, %s2693_s23 }
 0x7b0   : > { %v1800_v11 = vpop.permute.xlu0 %1799 }
 0x7b1   : > { %v1802_v12 = vsel %vm310_vm1, %v3214_v40, %v1800_v11 }
 0x7b2   : > { %1803 = vst [vmem:[%s296_s10] sm:$0xff] %v1802_v12 }
 0x7b3   : > { %2635 = shalt.err (!%p2632_p3)
}
 0x7b4   : > { %s2636_s23 = scalar_lea.hbm %s3274_s18, 128  ;;  %s2640_s26 = scalar_lea.hbm %s3326_s8, 256 }
 0x7b5   : > { %p2637_p4 = scmp.ne.s32.totalorder %s3274_s18, %s2636_s23  ;;  %p2641_p9 = scmp.lt.u32.totalorder %s3274_s18, %s3326_s8 }
 0x7b6   : > { %p2642_p10 = scmp.lt.u32.totalorder %s2640_s26, %s2636_s23  ;;  %p2644_p12 = scmp.lt.u32.totalorder %s2636_s23, %s3274_s18 }
 0x7b7   : > { %p2638_p7 = pnand %p2637_p4, %p2778_p5 }
 0x7b8   : > { %p2643_p11 = por %p2642_p10, %p2641_p9 }
 0x7b9   : > { %p2639_p8 = pneg %p2638_p7 }
 0x7ba   : > { %p2645_p13 = por %p2644_p12, %p2643_p11 }
 0x7bc   : > { %p2646_p0 = pnand %p2645_p13, %p2639_p8 }
 0x7be   : > { %2649 = shalt.err (!%p2646_p0)
}
 0x7bf   : > { %2565 = dma.vmem_to_hbm [thread:$0]  (%p2778_p5), %s3276_s12, 128, %s3274_s18, %s1805_s19  }
 0x7c0 PF: > { %p2571_p1 = scmp.ge.s32.totalorder %s2684_s30, 2  ;;  %s1830_s17 = sand.u32 1, %s2672_s27  }
 0x7c1   : > { %s1831_s20 = scalar_lea.sflag [#allocation3], %s1830_s17 }
 0x7c2   : > { %p2568_p2 = pnand %p2571_p1, %p2782_p6 }
 0x7c4   : > { %2667 = dma.done.wait (!%p2568_p2), %s1831_s20, 128  }
 0x7c5   : > { %2669 = vsyncadd (!%p2568_p2), %s1831_s20, 4294967168  ;;  %p18_p3 = scmp.ge.s32.totalorder %s2765_s11, 4   ;;  %s3329_s27 = smov %s2676_s28 }
 0x7c6   : > { %s3330_s28 = smov %s2680_s29  ;;  %s3331_s29 = smov %s2776_s14 }
 0x7c7   : > { %s3332_s30 = smov %s2765_s11  ;;  %20 = sbr.rel (!%p18_p3) target bundleno = 3 (0x3), region = 93 }
 0x7ce   :  { %1836 = vsyncpa [#allocation3], 1 }
 0x7cf   :  { %1838 = vsyncpa [#allocation3 + $0x1], 1 }

// kernel: tpu_custom_call.1
= control target key start
LH: loop header
LB: loop body
LE: loop exit
PB: predicated region body
PF: predicated region fallthrough
CT: control target
= control target key end

     0   :  { %13 = vsyncpa [#allocation3], 0  ;;  %s3318_s0 = inlined_call_operand.vmem [shape: f32[16,64], index: 0, kind: input, shape index: {}]   ;;  %s3319_s1 = inlined_call_operand.vmem [shape: f32[64,4], index: 1, kind: input, shape index: {}]   ;;  %s3320_s2 = inlined_call_operand.vmem [shape: f32[4,64], index: 2, kind: input, shape index: {}]   ;;  %s3321_s3 = inlined_call_operand.vmem [shape: f32[4,16,288], index: 3, kind: input, shape index: {}]   ;;  %s3322_s4 = inlined_call_operand.vmem [shape: f32[4,128,32], index: 4, kind: input, shape index: {}]   ;;  %s3323_s5 = inlined_call_operand.vmem [shape: f32[64,128], index: 5, kind: input, shape index: {}]   ;;  %s3324_s6 = inlined_call_operand.vmem [shape: f32[128,64], index: 6, kind: input, shape index: {}]   ;;  %s3325_s7 = inlined_call_operand.vmem [shape: f32[3,128], index: 7, kind: input, shape index: {}]   ;;  %s3326_s8 = inlined_call_operand.hbm [shape: f32[16,128], index: 8, kind: output, shape index: {}]  }
   0x1   :  { %15 = vsyncpa [#allocation3 + $0x1], 0  ;;  %s2740_s27 = smov 0   ;;  %s2742_s28 = smov 0  }
   0x2   :  { %s2744_s29 = smov 0   ;;  %s2746_s30 = smov 0  }
   0x3 LB: > { %s2761_s9 = sadd.s32 4294967295, %s2684_s30   ;;  %s1877_s10 = sadd.s32 4294967294, %s2684_s30   ;;  %s2684_s30 = sphi %s2746_s30, %s3332_s30   ;;  %s2680_s29 = sphi %s2744_s29, %s3331_s29   ;;  %s2676_s28 = sphi %s2742_s28, %s3330_s28   ;;  %s2672_s27 = sphi %s2740_s27, %s3329_s27  }
   0x4   : > { %s2765_s11 = sadd.s32 1, %s2684_s30   ;;  %s201_s12 = sadd.s32 1, %s2680_s29 }
   0x5   : > { %s198_s13 = ssub.s32 %s2684_s30, %s2765_s11  ;;  %p211_p0 = scmp.ne.s32.totalorder %s2680_s29, %s2676_s28 }
   0x6   : > { %p199_p1 = scmp.eq.s32.totalorder %s198_s13, 0  ;;  %p212_p2 = scmp.eq.s32.totalorder %s2761_s9, 1 }
   0x7   : > { %p217_p3 = scmp.ne.s32.totalorder %s2676_s28, %s2672_s27  ;;  %p218_p4 = scmp.eq.s32.totalorder %s1877_s10, 1 }
   0x8   : > { %s2776_s14 = scalar_select %p199_p1, %s2680_s29, %s201_s12  }
   0x9   : > { %p2778_p5 = por %p212_p2, %p211_p0  ;;  %p2782_p6 = por %p218_p4, %p217_p3 }
   0xa   : > { %p1880_p7 = scmp.ge.s32.totalorder %s2684_s30, 1  ;;  %p264_p8 = scmp.lt.s32.totalorder %s2684_s30, 3 }
   0xc   : > { %p265_p9 = pnand %p1880_p7, %p264_p8 }
   0xd   : > { %v302_v0 = vld [vmem:[%s3319_s1] sm:$0xff] (!%p265_p9)  ;;  %v303_v1 = vld [vmem:[%s3319_s1 + $0x8] sm:$0xff] (!%p265_p9)  ;;  %v304_v2 = vld [vmem:[%s3319_s1 + $0x10] sm:$0xff] (!%p265_p9)  ;;  %v2686_v3 = vmov (!%p265_p9), 0.0|0.0   ;;  %p297_p10 = scmp.lt.s32.totalorder (!%p265_p9), %s2761_s9, 1  ;;  %vm2687_vm0 = vmmov (!%p265_p9), 0  }
   0xe   : > { %268 = sbr.rel (%p265_p9) target bundleno = 1984 (0x7c0), region = 52  ;;  %2370 = vmatprep.subr.bf16.mxu0 (!%p265_p9), %v2686_v3  ;;  %v2371_v4 = vpack.c.bf16 (!%p265_p9), %v303_v1, %v302_v0  ;;  %2382 = vmatprep.subr.bf16.mxu1 (!%p265_p9), %v2686_v3  ;;  %v305_v5 = vld [vmem:[%s3319_s1 + $0x18] sm:$0xff] (!%p265_p9)  ;;  %v2688_v6 = vmov (!%p265_p9), 0.0   ;;  %v306_v8 = vld [vmem:[%s3319_s1 + $0x20] sm:$0xff] (!%p265_p9)  ;;  %v307_v9 = vld [vmem:[%s3319_s1 + $0x28] sm:$0xff] (!%p265_p9)  ;;  %vm310_vm1 = vcmask (!%p265_p9), 523264  }
   0xf   : > { %2116 = vmatprep.mubr.msk.f32.mxu0 (!%p265_p9), %vm2687_vm0, %v2688_v6  ;;  %2135 = vmatprep.mubr.msk.f32.mxu1 (!%p265_p9), %vm2687_vm0, %v2688_v6  ;;  %v2374_v7 = vpack.c.bf16 (!%p265_p9), %v305_v5, %v304_v2  ;;  %v2377_v10 = vpack.c.bf16 (!%p265_p9), %v307_v9, %v306_v8  ;;  %v308_v11 = vld [vmem:[%s3319_s1 + $0x30] sm:$0xff] (!%p265_p9)  ;;  %v309_v12 = vld [vmem:[%s3319_s1 + $0x38] sm:$0xff] (!%p265_p9)  ;;  %v466_v16 = vld [vmem:[%s3320_s2] sm:$0xf] (!%p265_p9)  ;;  %vm471_vm2 = vcmask (!%p265_p9), 1043456   ;;  %vm467_vm3 = vcmask (!%p265_p9), 31744  }
  0x10   : > { %2372 = vmatpush3.bf16.msra.mxu0 (!%p265_p9), %v2371_v4  ;;  %2384 = vmatpush3.bf16.msra.mxu1 (!%p265_p9), %v2371_v4  ;;  %v2380_v13 = vpack.c.bf16 (!%p265_p9), %v309_v12, %v308_v11  ;;  %v622_v29 = vld [vmem:[%s3321_s3 + $0x8] sm:$0xff] (!%p265_p9)  ;;  %v625_v30 = vld [vmem:[%s3321_s3 + $0x20] sm:$0xff] (!%p265_p9)  ;;  %v624_v33 = vld [vmem:[%s3321_s3 + $0x18] sm:$0xff] (!%p265_p9)  ;;  %vm627_vm5 = vcmask (!%p265_p9), 130048   ;;  %s2690_s26 = smov (!%p265_p9), 112   ;;  %s2691_s10 = smov (!%p265_p9), 96  }
  0x11   : > { %2373 = vmatprep.subr.bf16.mxu0 (!%p265_p9), %v2686_v3  ;;  %2385 = vmatprep.subr.bf16.mxu1 (!%p265_p9), %v2686_v3  ;;  %v2394_v31 = vpack.c.bf16 (!%p265_p9), %v625_v30, %v622_v29  ;;  %v621_v32 = vld [vmem:[%s3321_s3] sm:$0xff] (!%p265_p9)  ;;  %v623_v34 = vld [vmem:[%s3321_s3 + $0x10] sm:$0xff] (!%p265_p9)  ;;  %v626_v36 = vld [vmem:[%s3321_s3 + $0x28] sm:$0xff] (!%p265_p9)  ;;  %vm1614_vm10 = vcmask (!%p265_p9), 261120   ;;  %s2693_s23 = smov (!%p265_p9), 64  }
  0x12   : > { %v2396_v35 = vpack.c.bf16 (!%p265_p9), %v624_v33, %v621_v32  ;;  %v2399_v37 = vpack.c.bf16 (!%p265_p9), %v626_v36, %v623_v34  ;;  %v1892_v38 = vld [vmem:[%s3321_s3 + $0x38] sm:$0xff] (!%p265_p9)  ;;  %v1895_v39 = vld [vmem:[%s3321_s3 + $0x50] sm:$0xff] (!%p265_p9)  ;;  %v1894_v43 = vld [vmem:[%s3321_s3 + $0x48] sm:$0xff] (!%p265_p9) }
  0x13   : > { %v2401_v40 = vpack.c.bf16 (!%p265_p9), %v1895_v39, %v1892_v38  ;;  %v1891_v41 = vld [vmem:[%s3321_s3 + $0x30] sm:$0xff] (!%p265_p9)  ;;  %v1893_v44 = vld [vmem:[%s3321_s3 + $0x40] sm:$0xff] (!%p265_p9)  ;;  %v1896_v45 = vld [vmem:[%s3321_s3 + $0x58] sm:$0xff] (!%p265_p9) }
  0x14   : > { %2375 = vmatpush3.bf16.msra.mxu0 (!%p265_p9), %v2374_v7  ;;  %2387 = vmatpush3.bf16.msra.mxu1 (!%p265_p9), %v2374_v7  ;;  %v2403_v51 = vpack.c.bf16 (!%p265_p9), %v1894_v43, %v1891_v41  ;;  %v2406_v52 = vpack.c.bf16 (!%p265_p9), %v1896_v45, %v1893_v44  ;;  %v780_v53 = vld [vmem:[%s3322_s4] sm:$0xff] (!%p265_p9)  ;;  %v781_v54 = vld [vmem:[%s3322_s4 + $0x8] sm:$0xff] (!%p265_p9)  ;;  %v782_v58 = vld [vmem:[%s3322_s4 + $0x10] sm:$0xff] (!%p265_p9) }
  0x15   : > { %s298_s25 = scalar_select %p297_p10, %s2761_s9, 1  ;;  %2376 = vmatprep.subr.bf16.mxu0 %v2686_v3  ;;  %2388 = vmatprep.subr.bf16.mxu1 %v2686_v3  ;;  %v1899_v55 = vld [vmem:[%s3322_s4 + $0x80] sm:$0xff]  ;;  %v1900_v56 = vld [vmem:[%s3322_s4 + $0x88] sm:$0xff]  ;;  %v2433_v57 = vpack.c.bf16 %v781_v54, %v780_v53  ;;  %v783_v59 = vld [vmem:[%s3322_s4 + $0x18] sm:$0xff] }
  0x16   : > { %v2409_v60 = vpack.c.bf16 %v1900_v56, %v1899_v55  ;;  %v1901_v62 = vld [vmem:[%s3322_s4 + $0x90] sm:$0xff]  ;;  %v1902_v63 = vld [vmem:[%s3322_s4 + $0x98] sm:$0xff]  ;;  %v2436_v0 = vpack.c.bf16 %v783_v59, %v782_v58  ;;  %v784_v1 = vld [vmem:[%s3322_s4 + $0x20] sm:$0xff] }
  0x17   : > { %s1882_s17 = sshll.u32 %s298_s25, 3  ;;  %s2689_s25 = smov 80   ;;  %v785_v2 = vld [vmem:[%s3322_s4 + $0x28] sm:$0xff]  ;;  %v2412_v4 = vpack.c.bf16 %v1902_v63, %v1901_v62  ;;  %v1903_v5 = vld [vmem:[%s3322_s4 + $0xa0] sm:$0xff]  ;;  %v786_v9 = vld [vmem:[%s3322_s4 + $0x30] sm:$0xff] }
  0x18   : > { %s300_s24 = scalar_lea.vmem %s3318_s0, %s1882_s17  ;;  %2378 = vmatpush3.bf16.msra.mxu0 %v2377_v10  ;;  %2390 = vmatpush3.bf16.msra.mxu1 %v2377_v10  ;;  %v1904_v7 = vld [vmem:[%s3322_s4 + $0xa8] sm:$0xff]  ;;  %v2439_v8 = vpack.c.bf16 %v785_v2, %v784_v1  ;;  %v787_v10 = vld [vmem:[%s3322_s4 + $0x38] sm:$0xff]  ;;  %v1905_v12 = vld [vmem:[%s3322_s4 + $0xb0] sm:$0xff] }
  0x19   : > { %v301_v14 = vld [vmem:[%s300_s24] sm:$0xff]  ;;  %2379 = vmatprep.subr.bf16.mxu0 %v2686_v3  ;;  %2391 = vmatprep.subr.bf16.mxu1 %v2686_v3  ;;  %v2415_v11 = vpack.c.bf16 %v1904_v7, %v1903_v5  ;;  %v1908_v29 = vld [vmem:[%s3322_s4 + $0xc8] sm:$0xff]  ;;  %v1910_v32 = vld [vmem:[%s3322_s4 + $0xd8] sm:$0xff]  ;;  %s294_s24 = sand.u32 1, %s2676_s28  }
  0x1a   : > { %v384_v15 = vmul.f32 %v301_v14, %v301_v14  ;;  %v1911_v34 = vld [vmem:[%s3322_s4 + $0xe0] sm:$0xff]  ;;  %v1913_v38 = vld [vmem:[%s3322_s4 + $0xf0] sm:$0xff]  ;;  %v1914_v39 = vld [vmem:[%s3322_s4 + $0xf8] sm:$0xff]  ;;  %s1805_s19 = scalar_lea.sflag [#allocation3], %s294_s24 }
  0x1b   : > { %v1918_v44 = vld [vmem:[%s3321_s3 + $0x68] sm:$0xff]  ;;  %v1921_v45 = vld [vmem:[%s3321_s3 + $0x80] sm:$0xff]  ;;  %v1928_v54 = vld [vmem:[%s3322_s4 + $0x118] sm:$0xff] }
  0x1c   : > { %2381 = vmatpush3.bf16.msra.mxu0 %v2380_v13  ;;  %2393 = vmatpush3.bf16.msra.mxu1 %v2380_v13  ;;  %v1906_v13 = vld [vmem:[%s3322_s4 + $0xb8] sm:$0xff]  ;;  %v1929_v56 = vld [vmem:[%s3322_s4 + $0x120] sm:$0xff]  ;;  %v1919_v7 = vld [vmem:[%s3321_s3 + $0x70] sm:$0xff] }
  0x1d   : > { %2138 = vmatprep.subr.mxu0 %v2688_v6  ;;  %2143 = vmatprep.subr.mxu1 %v2688_v6  ;;  %v1920_v1 = vld [vmem:[%s3321_s3 + $0x78] sm:$0xff] }
  0x1f   : > { %2117 = vmatmul.mubr.msk.f32.vlgmr.msra.gmra.mrb[0].mxu0 %vm310_vm1, %v301_v14  ;;  %2136 = vmatmul.mubr.msk.f32.vlgmr.msra.gmra.mrb[0].mxu1 %vm310_vm1, %v384_v15  ;;  %v788_v15 = vld [vmem:[%s3322_s4 + $0x40] sm:$0xff] }
  0x20   : > { %2140 = vmatprep.mubr.msk.f32.mxu0 %vm2687_vm0, %v2688_v6  ;;  %2145 = vmatprep.mubr.msk.f32.mxu1 %vm2687_vm0, %v2688_v6 }
  0x21   : > { %2139 = vmatpush3.msk.msra.mxu0 %vm471_vm2, %v466_v16  ;;  %2144 = vmatpush3.msk.msra.mxu1 %vm471_vm2, %v466_v16  ;;  %v789_v16 = vld [vmem:[%s3322_s4 + $0x48] sm:$0xff] }
  0x22   : > { %2398 = vmatprep.subr.bf16.mxu1 %v2686_v3  ;;  %2395 = vmatprep.subr.bf16.mxu0 %v2394_v31  ;;  %v1909_v31 = vld [vmem:[%s3322_s4 + $0xd0] sm:$0xff] }
  0x23   : > { %v2424_v33 = vpack.c.bf16 %v1910_v32, %v1909_v31  ;;  %v1938_v31 = vld [vmem:[%s3322_s4 + $0x168] sm:$0xff] }
  0xf2   : > { %v380_v17 = vpop.f32.mrb[0].mxu0  ;;  %v454_v18 = vpop.f32.mrb[0].mxu1 }
  0xf3   : > { %v458_v19 = vmul.f32 0.0625, %v380_v17  ;;  %v2118_v20 = vpop.f32.mrb[1].mxu0  ;;  %v459_v21 = vmul.f32 0.0625, %v454_v18  ;;  %v2137_v22 = vpop.f32.mrb[1].mxu1  ;;  %v2418_v17 = vpack.c.bf16 %v1906_v13, %v1905_v12  ;;  %v2445_v18 = vpack.c.bf16 %v789_v16, %v788_v15  ;;  %v1942_v13 = vld [vmem:[%s3321_s3 + $0x90] sm:$0xff] }
  0xf4   : > { %v791_v20 = vld [vmem:[%s3322_s4 + $0x58] sm:$0xff]  ;;  %v792_v22 = vld [vmem:[%s3322_s4 + $0x60] sm:$0xff] }
  0xf5   : > { %v460_v23 = vmul.f32 %v458_v19, %v458_v19 }
  0xf7   : > { %v461_v24 = vsub.f32 %v459_v21, %v460_v23  ;;  %v793_v23 = vld [vmem:[%s3322_s4 + $0x68] sm:$0xff] }
  0xf9   : > { %v462_v25 = vmax.f32 %v461_v24, 0.0  ;;  %v2451_v24 = vpack.c.bf16 %v793_v23, %v792_v22  ;;  %v1932_v22 = vld [vmem:[%s3322_s4 + $0x138] sm:$0xff] }
  0xfb   : > { %2612 = vrsqrt.f32 %v462_v25  ;;  %vm463_vm4 = vcmp.le.f32.partialorder %v462_v25, 0.0  ;;  %v794_v25 = vld [vmem:[%s3322_s4 + $0x70] sm:$0xff] }
 0x105   : > { %v2613_v26 = vpop.eup %2612 }
 0x106   : > { %v465_v27 = vsel %vm463_vm4, 1.0, %v2613_v26  ;;  %v795_v26 = vld [vmem:[%s3322_s4 + $0x78] sm:$0xff] }
 0x107   : > { %2141 = vmatmul.mubr.msk.f32.vlgmr.msra.gmra.mrb[2].mxu0 %vm467_vm3, %v465_v27  ;;  %v545_v28 = vmul.f32 %v465_v27, %v458_v19  ;;  %v790_v19 = vld [vmem:[%s3322_s4 + $0x50] sm:$0xff]  ;;  %v2454_v27 = vpack.c.bf16 %v795_v26, %v794_v25  ;;  %v1934_v25 = vld [vmem:[%s3322_s4 + $0x148] sm:$0xff] }
 0x108   : > { %695 = vmatprep.mubr.f32.mxu0 %v2688_v6  ;;  %2397 = vmatpush1.bf16.msra.mxu0 %v2396_v35  ;;  %v2448_v21 = vpack.c.bf16 %v791_v20, %v790_v19  ;;  %v1912_v35 = vld [vmem:[%s3322_s4 + $0xe8] sm:$0xff] }
 0x109   : > { %2146 = vmatmul.mubr.msk.f32.vlgmr.msra.gmra.mrb[2].mxu1 %vm467_vm3, %v545_v28  ;;  %2402 = vmatprep.subr.bf16.mxu0 %v2401_v40  ;;  %v1907_v28 = vld [vmem:[%s3322_s4 + $0xc0] sm:$0xff]  ;;  %v2427_v36 = vpack.c.bf16 %v1912_v35, %v1911_v34  ;;  %v1940_v34 = vld [vmem:[%s3322_s4 + $0x178] sm:$0xff] }
 0x10a   : > { %2152 = vmatprep.mubr.msk.f32.mxu1 %vm2687_vm0, %v2688_v6  ;;  %2400 = vmatpush3.bf16.msra.mxu1 %v2399_v37  ;;  %v2421_v30 = vpack.c.bf16 %v1908_v29, %v1907_v28  ;;  %v1936_v28 = vld [vmem:[%s3322_s4 + $0x158] sm:$0xff] }
 0x10b   : > { %2405 = vmatprep.subr.bf16.mxu1 %v2686_v3 }
 0x1da   : > { %v541_v42 = vpop.f32.mrb[2].mxu0 }
 0x1db   : > { %v619_v46 = vmul.f32 %v541_v42, %v301_v14  ;;  %v2142_v47 = vpop.f32.mrb[3].mxu0  ;;  %v2442_v14 = vpack.c.bf16 %v787_v10, %v786_v9  ;;  %v2430_v42 = vpack.c.bf16 %v1914_v39, %v1913_v38  ;;  %v1943_v9 = vld [vmem:[%s3321_s3 + $0x98] sm:$0xff]  ;;  %v1946_v10 = vld [vmem:[%s3321_s3 + $0xb0] sm:$0xff] }
 0x1dc   : > { %v615_v48 = vpop.f32.mrb[2].mxu1  ;;  %v2456_v47 = vpack.c.bf16 %v1921_v45, %v1918_v44  ;;  %v2487_v12 = vpack.c.bf16 %v1946_v10, %v1943_v9  ;;  %v1963_v9 = vld [vmem:[%s3322_s4 + $0x1e8] sm:$0xff] }
 0x1dd   : > { %v620_v49 = vsub.f32 %v619_v46, %v615_v48  ;;  %v2147_v50 = vpop.f32.mrb[3].mxu1 }
 0x1de   : > { %v1925_v50 = vld [vmem:[%s3322_s4 + $0x100] sm:$0xff] }
 0x1df   : > { %1368 = vrot.lane.b32.xlu1 %v620_v49, %s2689_s25  ;;  %803 = vrot.lane.b32.xlu0 %v620_v49, %s2690_s26  ;;  %s1881_s25 = sshll.u32 %s294_s24, 3  ;;  %s1969_s26 = sshll.u32 %s2761_s9, 7 }
 0x1e0   : > { %1889 = vmatmul.mubr.msk.f32.vlgmr.msra.gmra.mrb[4].mxu0 %vm627_vm5, %v620_v49  ;;  %2153 = vmatmul.mubr.msk.f32.vlgmr.msra.gmra.mrb[4].mxu1 %vm627_vm5, %v620_v49  ;;  %s3274_s18 = scalar_lea.hbm %s3326_s8, %s1969_s26  ;;  %s2694_s9 = smov [#allocation2]  }
 0x1e1   : > { %2404 = vmatpush1.bf16.msra.mxu0 %v2403_v51  ;;  %2407 = vmatpush3.bf16.msra.mxu1 %v2406_v52  ;;  %v1926_v51 = vld [vmem:[%s3322_s4 + $0x108] sm:$0xff]  ;;  %v1927_v52 = vld [vmem:[%s3322_s4 + $0x110] sm:$0xff]  ;;  %s2626_s21 = sshll.u32 %s2694_s9, 4  ;;  %s2627_s21 = int_to_ptr.vmem [resolvable:$false] %s2626_s21 }
 0x1e2   : > { %871 = vmatprep.mubr.f32.mxu0 %v2688_v6  ;;  %2159 = vmatprep.mubr.msk.f32.mxu1 %vm2687_vm0, %v2688_v6  ;;  %v2464_v53 = vpack.c.bf16 %v1926_v51, %v1925_v50  ;;  %v2467_v55 = vpack.c.bf16 %v1928_v54, %v1927_v52  ;;  %v1950_v50 = vld [vmem:[%s3322_s4 + $0x180] sm:$0xff]  ;;  %v1951_v51 = vld [vmem:[%s3322_s4 + $0x188] sm:$0xff]  ;;  %s2628_s22 = scalar_lea.vmem %s2627_s21, 256 }
 0x1e3   : > { %1120 = vrot.lane.b32.xlu0 %v620_v49, %s2691_s10  ;;  %2432 = vmatprep.subr.bf16.mxu0 %v2686_v3  ;;  %s2692_s10 = smov 32  }
 0x1e4   : > { %2408 = vmatprep.subr.bf16.mxu1 %v2686_v3 }
 0x251   : > { %v804_v61 = vpop.permute.xlu0 %803  ;;  %v1369_v20 = vpop.permute.xlu1 %1368 }
 0x252   : > { %1897 = vmatmul.mubr.msk.f32.vlgmr.msra.gmra.mrb[6].mxu0 %vm627_vm5, %v804_v61  ;;  %2160 = vmatmul.mubr.msk.f32.vlgmr.msra.gmra.mrb[4].mxu1 %vm627_vm5, %v804_v61 }
 0x253   : > { %2434 = vmatpush3.bf16.msra.mxu0 %v2433_v57  ;;  %2229 = vmatprep.mubr.msk.f32.mxu0 %vm2687_vm0, %v2688_v6  ;;  %v1930_v57 = vld [vmem:[%s3322_s4 + $0x128] sm:$0xff] }
 0x254   : > { %2435 = vmatprep.subr.bf16.mxu0 %v2686_v3  ;;  %2410 = vmatpush3.bf16.msra.mxu1 %v2409_v60  ;;  %v2470_v58 = vpack.c.bf16 %v1930_v57, %v1929_v56  ;;  %v1953_v56 = vld [vmem:[%s3322_s4 + $0x198] sm:$0xff] }
 0x255   : > { %2411 = vmatprep.subr.bf16.mxu1 %v2686_v3  ;;  %2194 = vmatprep.mubr.msk.f32.mxu1 %vm2687_vm0, %v2688_v6  ;;  %v1121_v15 = vpop.permute.xlu0 %1120 }
 0x257   : > { %2437 = vmatpush3.bf16.msra.mxu0 %v2436_v0  ;;  %v1917_v0 = vld [vmem:[%s3321_s3 + $0x60] sm:$0xff] }
 0x258   : > { %2438 = vmatprep.subr.bf16.mxu0 %v2686_v3  ;;  %2413 = vmatpush3.bf16.msra.mxu1 %v2412_v4  ;;  %v2458_v4 = vpack.c.bf16 %v1920_v1, %v1917_v0  ;;  %v1958_v0 = vld [vmem:[%s3322_s4 + $0x1c0] sm:$0xff]  ;;  %v1959_v1 = vld [vmem:[%s3322_s4 + $0x1c8] sm:$0xff] }
 0x259   : > { %2414 = vmatprep.subr.bf16.mxu1 %v2686_v3 }
 0x25b   : > { %2440 = vmatpush3.bf16.msra.mxu0 %v2439_v8  ;;  %v1922_v8 = vld [vmem:[%s3321_s3 + $0x88] sm:$0xff] }
 0x25c   : > { %2441 = vmatprep.subr.bf16.mxu0 %v2686_v3  ;;  %2416 = vmatpush3.bf16.msra.mxu1 %v2415_v11  ;;  %v2461_v11 = vpack.c.bf16 %v1922_v8, %v1919_v7  ;;  %v1962_v8 = vld [vmem:[%s3322_s4 + $0x1e0] sm:$0xff] }
 0x25d   : > { %2417 = vmatprep.subr.bf16.mxu1 %v2686_v3  ;;  %v2513_v10 = vpack.c.bf16 %v1963_v9, %v1962_v8 }
 0x25f   : > { %2443 = vmatpush3.bf16.msra.mxu0 %v2442_v14  ;;  %v1945_v14 = vld [vmem:[%s3321_s3 + $0xa8] sm:$0xff] }
 0x260   : > { %2444 = vmatprep.subr.bf16.mxu0 %v2686_v3  ;;  %2419 = vmatpush3.bf16.msra.mxu1 %v2418_v17  ;;  %v2489_v16 = vpack.c.bf16 %v1945_v14, %v1942_v13  ;;  %v1944_v17 = vld [vmem:[%s3321_s3 + $0xa0] sm:$0xff] }
 0x261   : > { %2420 = vmatprep.subr.bf16.mxu1 %v2686_v3 }
 0x263   : > { %2446 = vmatpush3.bf16.msra.mxu0 %v2445_v18  ;;  %v1947_v18 = vld [vmem:[%s3321_s3 + $0xb8] sm:$0xff] }
 0x264   : > { %2447 = vmatprep.subr.bf16.mxu0 %v2686_v3  ;;  %2422 = vmatpush3.bf16.msra.mxu1 %v2421_v30  ;;  %v2492_v19 = vpack.c.bf16 %v1947_v18, %v1944_v17  ;;  %v1937_v30 = vld [vmem:[%s3322_s4 + $0x160] sm:$0xff]  ;;  %v1623_v17 = vld [vmem:[%s3323_s5 + $0x8] sm:$0xff]  ;;  %v1624_v18 = vld [vmem:[%s3323_s5 + $0x10] sm:$0xff] }
 0x265   : > { %2423 = vmatprep.subr.bf16.mxu1 %v2686_v3  ;;  %v2482_v32 = vpack.c.bf16 %v1938_v31, %v1937_v30  ;;  %v1616_v31 = vlaneseq }
 0x267   : > { %2449 = vmatpush3.bf16.msra.mxu0 %v2448_v21  ;;  %v1931_v21 = vld [vmem:[%s3322_s4 + $0x130] sm:$0xff] }
 0x268   : > { %2450 = vmatprep.subr.bf16.mxu0 %v2686_v3  ;;  %2425 = vmatpush3.bf16.msra.mxu1 %v2424_v33  ;;  %v2473_v23 = vpack.c.bf16 %v1932_v22, %v1931_v21  ;;  %v1939_v33 = vld [vmem:[%s3322_s4 + $0x170] sm:$0xff]  ;;  %v1626_v22 = vld [vmem:[%s3323_s5 + $0x20] sm:$0xff] }
 0x269   : > { %2426 = vmatprep.subr.bf16.mxu1 %v2686_v3  ;;  %v2485_v35 = vpack.c.bf16 %v1940_v34, %v1939_v33  ;;  %v1609_v34 = vld [vmem:[%s3325_s7] sm:$0x7] }
 0x26b   : > { %2452 = vmatpush3.bf16.msra.mxu0 %v2451_v24  ;;  %v1933_v24 = vld [vmem:[%s3322_s4 + $0x140] sm:$0xff] }
 0x26c   : > { %2453 = vmatprep.subr.bf16.mxu0 %v2686_v3  ;;  %2428 = vmatpush3.bf16.msra.mxu1 %v2427_v36  ;;  %v2476_v26 = vpack.c.bf16 %v1934_v25, %v1933_v24  ;;  %v1628_v25 = vld [vmem:[%s3323_s5 + $0x30] sm:$0xff] }
 0x26d   : > { %2429 = vmatprep.subr.bf16.mxu1 %v2686_v3 }
 0x26f   : > { %2455 = vmatpush3.bf16.msra.mxu0 %v2454_v27  ;;  %v1935_v27 = vld [vmem:[%s3322_s4 + $0x150] sm:$0xff] }
 0x270   : > { %2463 = vmatprep.subr.bf16.mxu0 %v2686_v3  ;;  %2431 = vmatpush3.bf16.msra.mxu1 %v2430_v42  ;;  %v2479_v29 = vpack.c.bf16 %v1936_v28, %v1935_v27 }
 0x271   : > { %2457 = vmatprep.subr.bf16.mxu1 %v2456_v47 }
 0x2b3   : > { %v697_v37 = vpop.f32.mrb[4].mxu0 }
 0x2b4   : > { %v773_v40 = vmul.f32 %v697_v37, %v697_v37  ;;  %v699_v41 = vpop.f32.mrb[5].mxu0 }
 0x2b5   : > { %v774_v43 = vmul.f32 %v699_v41, %v699_v41 }
 0x2b7   : > { %v775_v46 = vadd.f32 %v774_v43, %v773_v40 }
 0x2b9   : > { %2614 = vrsqrt.f32 %v775_v46  ;;  %vm776_vm6 = vcmp.gt.f32.partialorder %v775_v46, 0.0 }
 0x2c3   : > { %v2615_v48 = vpop.eup %2614 }
 0x2c4   : > { %v778_v49 = vmul.f32 %v2615_v48, %v775_v46 }
 0x2c6   : > { %2230 = vmatmul.mubr.msk.f32.vlgmr.msra.gmra.mrb[8].mxu0 %vm776_vm6, %v778_v49 }
 0x2c7   : > { %2271 = vmatprep.mubr.msk.f32.mxu0 %vm2687_vm0, %v2688_v6  ;;  %2465 = vmatpush3.bf16.msra.mxu0 %v2464_v53  ;;  %v2495_v53 = vpack.c.bf16 %v1951_v51, %v1950_v50  ;;  %v1716_v51 = vld [vmem:[%s3324_s6 + $0x40] sm:$0xff] }
 0x2c8   : > { %2466 = vmatprep.subr.bf16.mxu0 %v2686_v3 }
 0x2cb   : > { %2468 = vmatpush3.bf16.msra.mxu0 %v2467_v55  ;;  %v1952_v55 = vld [vmem:[%s3322_s4 + $0x190] sm:$0xff] }
 0x2cc   : > { %2469 = vmatprep.subr.bf16.mxu0 %v2686_v3  ;;  %v2498_v57 = vpack.c.bf16 %v1953_v56, %v1952_v55  ;;  %v1719_v55 = vld [vmem:[%s3324_s6 + $0x58] sm:$0xff] }
 0x2cf   : > { %2471 = vmatpush3.bf16.msra.mxu0 %v2470_v58  ;;  %v1954_v58 = vld [vmem:[%s3322_s4 + $0x1a0] sm:$0xff] }
 0x2d0   : > { %2472 = vmatprep.subr.bf16.mxu0 %v2686_v3 }
 0x2d3   : > { %2474 = vmatpush3.bf16.msra.mxu0 %v2473_v23  ;;  %v1627_v23 = vld [vmem:[%s3323_s5 + $0x28] sm:$0xff] }
 0x2d4   : > { %2475 = vmatprep.subr.bf16.mxu0 %v2686_v3  ;;  %v2525_v24 = vpack.c.bf16 %v1627_v23, %v1626_v22 }
 0x2d7   : > { %2477 = vmatpush3.bf16.msra.mxu0 %v2476_v26  ;;  %v1629_v26 = vld [vmem:[%s3323_s5 + $0x38] sm:$0xff] }
 0x2d8   : > { %2478 = vmatprep.subr.bf16.mxu0 %v2686_v3  ;;  %v2528_v27 = vpack.c.bf16 %v1629_v26, %v1628_v25 }
 0x2db   : > { %2480 = vmatpush3.bf16.msra.mxu0 %v2479_v29 }
 0x2dc   : > { %2481 = vmatprep.subr.bf16.mxu0 %v2686_v3 }
 0x2df   : > { %2483 = vmatpush3.bf16.msra.mxu0 %v2482_v32  ;;  %v1617_v32 = vshrl.u32 %v1616_v31, 7 }
 0x2e0   : > { %2484 = vmatprep.subr.bf16.mxu0 %v2686_v3 }
 0x2e1   : > { %v1618_v33 = vsub.s32 0, %v1617_v32 }
 0x2e3   : > { %2486 = vmatpush3.bf16.msra.mxu0 %v2485_v35  ;;  %v1619_v35 = vrot.slane %v1609_v34, %v1618_v33 }
 0x2e4   : > { %2494 = vmatprep.subr.bf16.mxu0 %v2686_v3 }
 0x325   : > { %v873_v59 = vpop.f32.mrb[6].mxu0 }
 0x326   : > { %v949_v60 = vmul.f32 %v873_v59, %v873_v59  ;;  %v875_v61 = vpop.f32.mrb[7].mxu0  ;;  %v1955_v59 = vld [vmem:[%s3322_s4 + $0x1a8] sm:$0xff] }
 0x327   : > { %v950_v62 = vmul.f32 %v875_v61, %v875_v61  ;;  %v1956_v61 = vld [vmem:[%s3322_s4 + $0x1b0] sm:$0xff] }
 0x329   : > { %v951_v63 = vadd.f32 %v950_v62, %v949_v60  ;;  %v2501_v60 = vpack.c.bf16 %v1955_v59, %v1954_v58  ;;  %v1957_v62 = vld [vmem:[%s3322_s4 + $0x1b8] sm:$0xff]  ;;  %v1721_v58 = vld [vmem:[%s3324_s6 + $0x68] sm:$0xff] }
 0x32b   : > { %2616 = vrsqrt.f32 %v951_v63  ;;  %vm952_vm7 = vcmp.gt.f32.partialorder %v951_v63, 0.0 }
 0x335   : > { %v2617_v2 = vpop.eup %2616 }
 0x336   : > { %v954_v5 = vmul.f32 %v2617_v2, %v951_v63  ;;  %v2504_v63 = vpack.c.bf16 %v1957_v62, %v1956_v61  ;;  %v2507_v2 = vpack.c.bf16 %v1959_v1, %v1958_v0  ;;  %v1723_v61 = vld [vmem:[%s3324_s6 + $0x78] sm:$0xff] }
 0x338   : > { %2195 = vmatmul.mubr.msk.f32.vlgmr.msra.gmra.mrb[6].mxu1 %vm952_vm7, %v954_v5  ;;  %v1961_v5 = vld [vmem:[%s3322_s4 + $0x1d8] sm:$0xff] }
 0x339   : > { %2459 = vmatpush1.bf16.msra.mxu1 %v2458_v4  ;;  %1188 = vmatprep.mubr.f32.mxu1 %v2688_v6  ;;  %v1960_v4 = vld [vmem:[%s3322_s4 + $0x1d0] sm:$0xff] }
 0x33a   : > { %2460 = vmatprep.subr.bf16.mxu1 %v2686_v3  ;;  %v2510_v7 = vpack.c.bf16 %v1961_v5, %v1960_v4 }
 0x33c   : > { %1923 = vmatmul.mubr.msk.f32.vlgmr.msra.gmra.mrb[8].mxu1 %vm627_vm5, %v1121_v15 }
 0x33d   : > { %2462 = vmatpush3.bf16.msra.mxu1 %v2461_v11  ;;  %2236 = vmatprep.mubr.msk.f32.mxu1 %vm2687_vm0, %v2688_v6  ;;  %v1964_v11 = vld [vmem:[%s3322_s4 + $0x1f0] sm:$0xff] }
 0x33e   : > { %2488 = vmatprep.subr.bf16.mxu1 %v2487_v12  ;;  %v1965_v12 = vld [vmem:[%s3322_s4 + $0x1f8] sm:$0xff] }
 0x33f   : > { %v2516_v13 = vpack.c.bf16 %v1965_v12, %v1964_v11 }
 0x340   : > { %2237 = vmatmul.mubr.msk.f32.vlgmr.msra.gmra.mrb[4].mxu1 %vm627_vm5, %v1121_v15 }
 0x341   : > { %2490 = vmatpush1.bf16.msra.mxu1 %v2489_v16  ;;  %1436 = vmatprep.mubr.f32.mxu1 %v2688_v6  ;;  %v1622_v16 = vld [vmem:[%s3323_s5] sm:$0xff] }
 0x342   : > { %2491 = vmatprep.subr.bf16.mxu1 %v2686_v3 }
 0x344   : > { %1948 = vmatmul.mubr.msk.f32.vlgmr.msra.gmra.mrb[10].mxu1 %vm627_vm5, %v1369_v20 }
 0x345   : > { %2493 = vmatpush3.bf16.msra.mxu1 %v2492_v19  ;;  %2278 = vmatprep.mubr.msk.f32.mxu1 %vm2687_vm0, %v2688_v6  ;;  %v2519_v19 = vpack.c.bf16 %v1623_v17, %v1622_v16 }
 0x346   : > { %2518 = vmatprep.subr.bf16.mxu1 %v2686_v3 }
 0x348   : > { %2279 = vmatmul.mubr.msk.f32.vlgmr.msra.gmra.mrb[4].mxu1 %vm627_vm5, %v1369_v20  ;;  %v1625_v20 = vld [vmem:[%s3323_s5 + $0x18] sm:$0xff] }
 0x349   : > { %2332 = vmatprep.mubr.msk.f32.mxu1 %vm2687_vm0, %v2688_v6  ;;  %2520 = vmatpush3.bf16.msra.mxu1 %v2519_v19  ;;  %v2522_v21 = vpack.c.bf16 %v1625_v20, %v1624_v18 }
 0x34a   : > { %2521 = vmatprep.subr.bf16.mxu1 %v2686_v3 }
 0x34d   : > { %2523 = vmatpush3.bf16.msra.mxu1 %v2522_v21 }
 0x34e   : > { %2524 = vmatprep.subr.bf16.mxu1 %v2686_v3 }
 0x351   : > { %2526 = vmatpush3.bf16.msra.mxu1 %v2525_v24 }
 0x352   : > { %2527 = vmatprep.subr.bf16.mxu1 %v2686_v3 }
 0x355   : > { %2529 = vmatpush3.bf16.msra.mxu1 %v2528_v27 }
 0x356   : > { %2530 = vmatprep.subr.bf16.mxu1 %v2686_v3 }
 0x40b   : > { %v3114_v36 = vpop.f32.mrb[6].mxu1 }
 0x40c   : > { %v2196_v37 = vpop.f32.mrb[7].mxu1 }
 0x40f   : > { %v1190_v38 = vpop.f32.mrb[8].mxu1 }
 0x410   : > { %v1266_v39 = vmul.f32 %v1190_v38, %v1190_v38  ;;  %v1192_v40 = vpop.f32.mrb[9].mxu1  ;;  %v1708_v38 = vld [vmem:[%s3324_s6] sm:$0xff] }
 0x411   : > { %v1267_v41 = vmul.f32 %v1192_v40, %v1192_v40 }
 0x413   : > { %v1268_v42 = vadd.f32 %v1267_v41, %v1266_v39 }
 0x415   : > { %2618 = vrsqrt.f32 %v1268_v42  ;;  %vm1269_vm8 = vcmp.gt.f32.partialorder %v1268_v42, 0.0 }
 0x417   : > { %v1438_v43 = vpop.f32.mrb[10].mxu1 }
 0x418   : > { %v1514_v44 = vmul.f32 %v1438_v43, %v1438_v43  ;;  %v1440_v45 = vpop.f32.mrb[11].mxu1  ;;  %v1710_v43 = vld [vmem:[%s3324_s6 + $0x10] sm:$0xff] }
 0x419   : > { %v1515_v46 = vmul.f32 %v1440_v45, %v1440_v45 }
 0x41b   : > { %v1516_v47 = vadd.f32 %v1515_v46, %v1514_v44  ;;  %v3116_v48 = vpop.f32.mrb[4].mxu1  ;;  %v1711_v44 = vld [vmem:[%s3324_s6 + $0x18] sm:$0xff]  ;;  %v1712_v46 = vld [vmem:[%s3324_s6 + $0x20] sm:$0xff] }
 0x41c   : > { %v2280_v49 = vpop.f32.mrb[5].mxu1  ;;  %v2534_v45 = vpack.c.bf16 %v1711_v44, %v1710_v43 }
 0x41d   : > { %2620 = vrsqrt.f32 %v1516_v47  ;;  %vm1517_vm9 = vcmp.gt.f32.partialorder %v1516_v47, 0.0  ;;  %v1714_v49 = vld [vmem:[%s3324_s6 + $0x30] sm:$0xff] }
 0x41f   : > { %v2619_v52 = vpop.eup %2618 }
 0x420   : > { %v1271_v54 = vmul.f32 %v2619_v52, %v1268_v42  ;;  %v1717_v52 = vld [vmem:[%s3324_s6 + $0x48] sm:$0xff] }
 0x422   : > { %2272 = vmatmul.mubr.msk.f32.vlgmr.msra.gmra.mrb[8].mxu0 %vm1269_vm8, %v1271_v54  ;;  %v1718_v54 = vld [vmem:[%s3324_s6 + $0x50] sm:$0xff] }
 0x423   : > { %2496 = vmatpush3.bf16.msra.mxu0 %v2495_v53  ;;  %2313 = vmatprep.mubr.msk.f32.mxu0 %vm2687_vm0, %v2688_v6  ;;  %v2543_v53 = vpack.c.bf16 %v1717_v52, %v1716_v51  ;;  %v2546_v56 = vpack.c.bf16 %v1719_v55, %v1718_v54 }
 0x424   : > { %2497 = vmatprep.subr.bf16.mxu0 %v2686_v3 }
 0x427   : > { %2499 = vmatpush3.bf16.msra.mxu0 %v2498_v57  ;;  %v2621_v14 = vpop.eup %2620  ;;  %v1720_v57 = vld [vmem:[%s3324_s6 + $0x60] sm:$0xff] }
 0x428   : > { %2500 = vmatprep.subr.bf16.mxu0 %v2686_v3  ;;  %v1519_v15 = vmul.f32 %v2621_v14, %v1516_v47  ;;  %v1713_v47 = vld [vmem:[%s3324_s6 + $0x28] sm:$0xff]  ;;  %v2549_v59 = vpack.c.bf16 %v1721_v58, %v1720_v57 }
 0x42b   : > { %2502 = vmatpush3.bf16.msra.mxu0 %v2501_v60  ;;  %v1722_v60 = vld [vmem:[%s3324_s6 + $0x70] sm:$0xff] }
 0x42c   : > { %2503 = vmatprep.subr.bf16.mxu0 %v2686_v3  ;;  %v2552_v62 = vpack.c.bf16 %v1723_v61, %v1722_v60 }
 0x42f   : > { %2505 = vmatpush3.bf16.msra.mxu0 %v2504_v63  ;;  %v1632_v63 = vsub.s32 1, %v1617_v32 }
 0x430   : > { %2506 = vmatprep.subr.bf16.mxu0 %v2686_v3 }
 0x431   : > { %v1633_v0 = vrot.slane %v1609_v34, %v1632_v63 }
 0x433   : > { %2508 = vmatpush3.bf16.msra.mxu0 %v2507_v2 }
 0x434   : > { %2509 = vmatprep.subr.bf16.mxu0 %v2686_v3 }
 0x437   : > { %2511 = vmatpush3.bf16.msra.mxu0 %v2510_v7 }
 0x438   : > { %2512 = vmatprep.subr.bf16.mxu0 %v2686_v3 }
 0x43b   : > { %2514 = vmatpush3.bf16.msra.mxu0 %v2513_v10 }
 0x43c   : > { %2515 = vmatprep.subr.bf16.mxu0 %v2686_v3 }
 0x43f   : > { %2517 = vmatpush3.bf16.msra.mxu0 %v2516_v13 }
 0x442   : > { %2314 = vmatmul.mubr.msk.f32.vlgmr.msra.gmra.mrb[8].mxu0 %vm1517_vm9, %v1519_v15 }
 0x515   : > { %v1604_v28 = vpop.f32.mrb[8].mxu0 }
 0x516   : > { %v2554_v29 = vadd.f32 %v1604_v28, %v3114_v36  ;;  %v2315_v30 = vpop.f32.mrb[9].mxu0  ;;  %v1709_v36 = vld [vmem:[%s3324_s6 + $0x8] sm:$0xff] }
 0x517   : > { %v2531_v41 = vpack.c.bf16 %v1709_v36, %v1708_v38 }
 0x518   : > { %1611 = vrot.lane.b32.xlu1 %v2554_v29, %s2692_s10  ;;  %s296_s10 = scalar_lea.vmem [#allocation2], %s1881_s25 }
 0x519   : > { %s1818_s12 = sshll.u32 %s296_s10, 4  ;;  %s3276_s12 = int_to_ptr.vmem [resolvable:$true] %s1818_s12 }
 0x51a   : > { %s2622_s20 = scalar_lea.vmem %s3276_s12, 128  ;;  %p2629_p0 = scmp.lt.s32.totalorder %s3276_s12, %s2627_s21 }
 0x51b   : > { %p2623_p11 = scmp.ne.s32.totalorder %s3276_s12, %s2622_s20  ;;  %p2630_p1 = scmp.lt.s32.totalorder %s2628_s22, %s2622_s20 }
 0x51d   : > { %p2624_p12 = pnand %p2623_p11, %p2778_p5  ;;  %p2631_p2 = por %p2630_p1, %p2629_p0 }
 0x51f   : > { %p2625_p13 = pneg %p2624_p12 }
 0x521   : > { %p2632_p3 = pnand %p2631_p2, %p2625_p13 }
 0x58a   : > { %v1612_v37 = vpop.permute.xlu1 %1611 }
 0x58b   : > { %v1615_v39 = vsel %vm1614_vm10, %v3116_v48, %v1612_v37  ;;  %v2537_v48 = vpack.c.bf16 %v1713_v47, %v1712_v46 }
 0x58c   : > { %v3214_v40 = vadd.f32 %v1619_v35, %v1615_v39 }
 0x58e   : > { %v1621_v42 = vmax.f32 %v3214_v40, 0.0 }
 0x590   : > { %2333 = vmatmul.mubr.msk.f32.vlgmr.msra.gmra.mrb[12].mxu1 %vm310_vm1, %v1621_v42 }
 0x591   : > { %2532 = vmatpush3.bf16.msra.mxu1 %v2531_v41  ;;  %2367 = vmatprep.mubr.msk.f32.mxu1 %vm2687_vm0, %v2688_v6  ;;  %v1715_v6 = vld [vmem:[%s3324_s6 + $0x38] sm:$0xff] }
 0x592   : > { %2533 = vmatprep.subr.bf16.mxu1 %v2686_v3  ;;  %v2540_v50 = vpack.c.bf16 %v1715_v6, %v1714_v49 }
 0x595   : > { %2535 = vmatpush3.bf16.msra.mxu1 %v2534_v45 }
 0x596   : > { %2536 = vmatprep.subr.bf16.mxu1 %v2686_v3 }
 0x599   : > { %2538 = vmatpush3.bf16.msra.mxu1 %v2537_v48 }
 0x59a   : > { %2539 = vmatprep.subr.bf16.mxu1 %v2686_v3 }
 0x59d   : > { %2541 = vmatpush3.bf16.msra.mxu1 %v2540_v50 }
 0x59e   : > { %2542 = vmatprep.subr.bf16.mxu1 %v2686_v3 }
 0x5a1   : > { %2544 = vmatpush3.bf16.msra.mxu1 %v2543_v53 }
 0x5a2   : > { %2545 = vmatprep.subr.bf16.mxu1 %v2686_v3 }
 0x5a5   : > { %2547 = vmatpush3.bf16.msra.mxu1 %v2546_v56 }
 0x5a6   : > { %2548 = vmatprep.subr.bf16.mxu1 %v2686_v3 }
 0x5a9   : > { %2550 = vmatpush3.bf16.msra.mxu1 %v2549_v59 }
 0x5aa   : > { %2551 = vmatprep.subr.bf16.mxu1 %v2686_v3  ;;  %v1726_v3 = vsub.s32 2, %v1617_v32 }
 0x5ac   : > { %v1727_v7 = vrot.slane %v1609_v34, %v1726_v3 }
 0x5ad   : > { %2553 = vmatpush3.bf16.msra.mxu1 %v2552_v62 }
 0x663   : > { %v1703_v1 = vpop.f32.mrb[12].mxu1 }
 0x664   : > { %v1704_v2 = vadd.f32 %v1703_v1, %v1633_v0  ;;  %v2334_v4 = vpop.f32.mrb[13].mxu1 }
 0x666   : > { %v1707_v5 = vmax.f32 %v1704_v2, 0.0 }
 0x668   : > { %2368 = vmatmul.mubr.f32.vlgmr.msra.gmra.mrb[14].mxu1 %v1707_v5 }
 0x73b   : > { %v1794_v8 = vpop.f32.mrb[14].mxu1 }
 0x73c   : > { %v1795_v9 = vadd.f32 %v1794_v8, %v1727_v7  ;;  %v2369_v10 = vpop.f32.mrb[15].mxu1 }
 0x73e   : > { %1799 = vrot.lane.b32.xlu0 %v1795_v9, %s2693_s23 }
 0x7b0   : > { %v1800_v11 = vpop.permute.xlu0 %1799 }
 0x7b1   : > { %v1802_v12 = vsel %vm310_vm1, %v3214_v40, %v1800_v11 }
 0x7b2   : > { %1803 = vst [vmem:[%s296_s10] sm:$0xff] %v1802_v12 }
 0x7b3   : > { %2635 = shalt.err (!%p2632_p3)
}
 0x7b4   : > { %s2636_s23 = scalar_lea.hbm %s3274_s18, 128  ;;  %s2640_s26 = scalar_lea.hbm %s3326_s8, 256 }
 0x7b5   : > { %p2637_p4 = scmp.ne.s32.totalorder %s3274_s18, %s2636_s23  ;;  %p2641_p9 = scmp.lt.u32.totalorder %s3274_s18, %s3326_s8 }
 0x7b6   : > { %p2642_p10 = scmp.lt.u32.totalorder %s2640_s26, %s2636_s23  ;;  %p2644_p12 = scmp.lt.u32.totalorder %s2636_s23, %s3274_s18 }
 0x7b7   : > { %p2638_p7 = pnand %p2637_p4, %p2778_p5 }
 0x7b8   : > { %p2643_p11 = por %p2642_p10, %p2641_p9 }
 0x7b9   : > { %p2639_p8 = pneg %p2638_p7 }
 0x7ba   : > { %p2645_p13 = por %p2644_p12, %p2643_p11 }
 0x7bc   : > { %p2646_p0 = pnand %p2645_p13, %p2639_p8 }
 0x7be   : > { %2649 = shalt.err (!%p2646_p0)
}
 0x7bf   : > { %2565 = dma.vmem_to_hbm [thread:$0]  (%p2778_p5), %s3276_s12, 128, %s3274_s18, %s1805_s19  }
 0x7c0 PF: > { %p2571_p1 = scmp.ge.s32.totalorder %s2684_s30, 2  ;;  %s1830_s17 = sand.u32 1, %s2672_s27  }
 0x7c1   : > { %s1831_s20 = scalar_lea.sflag [#allocation3], %s1830_s17 }
 0x7c2   : > { %p2568_p2 = pnand %p2571_p1, %p2782_p6 }
 0x7c4   : > { %2667 = dma.done.wait (!%p2568_p2), %s1831_s20, 128  }
 0x7c5   : > { %2669 = vsyncadd (!%p2568_p2), %s1831_s20, 4294967168  ;;  %p18_p3 = scmp.ge.s32.totalorder %s2765_s11, 4   ;;  %s3329_s27 = smov %s2676_s28 }
 0x7c6   : > { %s3330_s28 = smov %s2680_s29  ;;  %s3331_s29 = smov %s2776_s14 }
 0x7c7   : > { %s3332_s30 = smov %s2765_s11  ;;  %20 = sbr.rel (!%p18_p3) target bundleno = 3 (0x3), region = 93 }
 0x7ce   :  { %1836 = vsyncpa [#allocation3], 1 }
 0x7cf   :  { %1838 = vsyncpa [#allocation3 + $0x1], 1 }

</bundles_post_ra>
